<compile_context>
chip_gen: v7x
topology: tpu7x:2x2x1
jax: 0.10.0
libtpu: 0.0.40
codegen_flags: <defaults>
</compile_context>

<pallas_src>
import functools

import jax
import jax.numpy as jnp
from jax.experimental import pallas as pl
from jax.experimental.pallas import tpu as pltpu

ENC_LAYERS = 16     # `enc_layers` in the reference code
KH = KW = 2
PAD = 2
BN_EPS = 1e-5
LANE = 128          # conv spatial axis and E are padded to this


def _round_up(v, m):
    return (v + m - 1) // m * m


# ---------------------------------------------------------------------------
# Fused kernel: conv(matmul) + BatchNorm(batch stats) + ReLU + Linear + ReLU
# ---------------------------------------------------------------------------
def _fused_embed_kernel(patches_ref, wconv_ref, gamma_ref, beta_ref,
                        wlin_ref, blin_ref, out_ref, feat_ref, lhs_ref,
                        *, n_valid, n_pad_lanes, n_batch, s_pad):
    """All refs live in VMEM.

    patches_ref: (K, N*S_pad)       bf16  im2col patches, lane axis = (n, sp)
    wconv_ref:   (OC, K)            bf16  conv weight, rows = out channels
    gamma_ref:   (OC, 1)            f32   BN gamma
    beta_ref:    (OC, 1)            f32   BN beta
    wlin_ref:    (OC*S_pad, E_pad)  bf16  linear weight in NCHW-flatten order,
                                          zero rows at spatial-pad slots,
                                          zero cols at E-pad slots
    blin_ref:    (1, E_pad)         f32   linear bias (zero-padded)
    out_ref:     (N, E_pad)         f32   module output (lane-dense)
    feat_ref:    (OC, N*S_pad)      bf16  scratch: post-BN/ReLU features
    lhs_ref:     (N, OC*S_pad)      bf16  scratch: NCHW-flattened linear LHS
    n_valid:     N*OH*OW        (real element count for BN statistics)
    n_pad_lanes: N*(S_pad - S)  (zero padding lanes per channel)
    """
    n_ch = wconv_ref.shape[0]

    # ---- Conv for the whole batch as ONE MXU matmul ----
    # Conv bias omitted: training-mode BN subtracts the batch mean next, so
    # the bias cancels exactly.  Padded spatial lanes are exactly zero (zero
    # patches, no bias).
    conv = jnp.dot(wconv_ref[...], patches_ref[...],
                   preferred_element_type=jnp.float32)          # (OC, N*S_pad)

    # ---- BatchNorm2d batch statistics (biased variance, centered pass) ----
    inv_cnt = 1.0 / n_valid
    mean = jnp.sum(conv, axis=-1, keepdims=True) * inv_cnt      # (OC, 1)
    centered = conv - mean
    ss = jnp.sum(centered * centered, axis=-1, keepdims=True)   # (OC, 1)
    # Each zero-padding lane contributed exactly mean**2 to ss; remove it.
    var = jnp.maximum((ss - n_pad_lanes * (mean * mean)) * inv_cnt, 0.0)
    scale = jax.lax.rsqrt(var + BN_EPS) * gamma_ref[...]        # (OC, 1)
    shift = beta_ref[...] - mean * scale                        # (OC, 1)

    # ---- BN affine + ReLU (f32 math, v5e-safe), single cast to bf16 ----
    feat_ref[...] = jnp.maximum(conv * scale + shift, 0.0).astype(jnp.bfloat16)

    # ---- Relayout (channel, batch) -> (batch, channel) for the NCHW flatten.
    # Each copy is a contiguous, 128-aligned lane slice of one sublane row;
    # OC*N copies total.  (The transpose between the conv's channel dim and
    # the linear's batch dim is mathematically unavoidable; this is its
    # cheapest certain-to-lower form at small N.)
    for ch in range(n_ch):
        dst = ch * s_pad
        for n in range(n_batch):
            lhs_ref[n:n + 1, dst:dst + s_pad] = \
                feat_ref[ch:ch + 1, n * s_pad:(n + 1) * s_pad]

    # ---- Linear + ReLU as a SINGLE long-K matmul ----
    # Padded feat lanes (which are max(shift,0) != 0 after ReLU) multiply the
    # exactly-zero wlin rows at those positions, so they contribute nothing.
    acc = jnp.dot(lhs_ref[...], wlin_ref[...],
                  preferred_element_type=jnp.float32)           # (N, E_pad)
    out_ref[...] = jnp.maximum(acc + blin_ref[...], 0.0)


# ---------------------------------------------------------------------------
# One-time parameter layout / dtype preparation (NOT per forward call)
# ---------------------------------------------------------------------------
def prepare_params(params):
    conv_w = params["conv_w"]                    # (OC, C, KH, KW)
    lin_w = params["lin_w"]                      # (E, OC*OH*OW)  PyTorch layout
    oc, c, kh, kw = conv_w.shape
    e, flat = lin_w.shape
    s = flat // oc                               # OH*OW
    assert flat == oc * s
    s_pad = _round_up(s, LANE)
    e_pad = _round_up(e, LANE)

    # Conv weight: (OC, C*KH*KW), bf16 MXU operand.
    wconv_t = conv_w.reshape(oc, c * kh * kw).astype(jnp.bfloat16)

    # Linear weight: PyTorch NCHW flatten -> feature index c*S + sp.
    # Group per conv channel, zero-pad the spatial axis to S_pad, transpose to
    # (features, E), zero-pad E to E_pad (lane-dense output), cast bf16.
    w3 = lin_w.reshape(e, oc, s)
    w3 = jnp.pad(w3, ((0, 0), (0, 0), (0, s_pad - s)))
    w3 = jnp.transpose(w3, (1, 2, 0)).reshape(oc * s_pad, e)
    w3 = jnp.pad(w3, ((0, 0), (0, e_pad - e))).astype(jnp.bfloat16)

    # Correctness invariant: rows at spatial-padding positions MUST be zero
    # (padded feat lanes are nonzero after BN+ReLU and rely on this to cancel).
    w_chk = w3.reshape(oc, s_pad, e_pad)
    assert bool(jnp.all(w_chk[:, s:, :] == 0)), "wlin spatial-pad rows not zero"

    blin = jnp.pad(params["lin_b"].reshape(1, e).astype(jnp.float32),
                   ((0, 0), (0, e_pad - e)))

    # NOTE: params["conv_b"] is intentionally unused -- it is cancelled
    # exactly by the training-mode BatchNorm mean subtraction.
    return {
        "wconv_t": wconv_t,
        "gamma": params["bn_g"].reshape(oc, 1).astype(jnp.float32),
        "beta": params["bn_b"].reshape(oc, 1).astype(jnp.float32),
        "wlin": w3,                              # (OC*S_pad, E_pad) bf16
        "blin": blin,                            # (1, E_pad) f32
    }


# ---------------------------------------------------------------------------
# Embed forward (single fused pallas_call)
# ---------------------------------------------------------------------------
@functools.partial(jax.jit, static_argnums=(2,))
def embed_forward(x, p, embedding_dim):
    """x: (N, C, H, W) float32, NCHW like PyTorch.  p: prepare_params output."""
    n, c, h, w = x.shape
    oh = h + 2 * PAD - KH + 1
    ow = w + 2 * PAD - KW + 1
    s = oh * ow
    k = c * KH * KW
    oc = p["wconv_t"].shape[0]
    oc_spad, e_pad = p["wlin"].shape
    s_pad = oc_spad // oc
    assert s_pad == _round_up(s, LANE)

    # --- im2col glue (pure data movement in XLA): (K, N*S_pad) bf16 ---
    x_pad = jnp.pad(x, ((0, 0), (0, 0), (PAD, PAD), (PAD, PAD)))
    slices = [x_pad[:, :, dy:dy + oh, dx:dx + ow]
              for dy in range(KH) for dx in range(KW)]
    patches = jnp.stack(slices, axis=2)                  # (N, C, KH*KW, OH, OW)
    patches = patches.reshape(n, k, s)                   # k = c*4 + dy*2 + dx
    patches = jnp.pad(patches, ((0, 0), (0, 0), (0, s_pad - s)))
    patches = jnp.transpose(patches, (1, 0, 2)).reshape(k, n * s_pad)
    patches = patches.astype(jnp.bfloat16)
    # TODO(synk): for large H/W do the KH*KW unroll on a VMEM-resident x_pad
    # inside the kernel instead of materializing the 4x-duplicated patches.

    kernel = functools.partial(
        _fused_embed_kernel,
        n_valid=float(n * s),
        n_pad_lanes=float(n * (s_pad - s)),
        n_batch=n,
        s_pad=s_pad,
    )

    out_pad = pl.pallas_call(
        kernel,
        out_shape=jax.ShapeDtypeStruct((n, e_pad), jnp.float32),
        in_specs=[pl.BlockSpec(memory_space=pltpu.MemorySpace.VMEM)] * 6,
        out_specs=pl.BlockSpec(memory_space=pltpu.MemorySpace.VMEM),
        scratch_shapes=[
            pltpu.VMEM((oc, n * s_pad), jnp.bfloat16),   # feat scratch (bf16)
            pltpu.VMEM((n, oc * s_pad), jnp.bfloat16),   # linear LHS scratch
        ],
    )(patches, p["wconv_t"], p["gamma"], p["beta"], p["wlin"], p["blin"])

    return out_pad[:, :embedding_dim]


# ---------------------------------------------------------------------------
# Pure-JAX reference (f32) for a sanity check
# ---------------------------------------------------------------------------
def _reference_forward(x, params):
    conv = jax.lax.conv_general_dilated(
        x, params["conv_w"], window_strides=(1, 1),
        padding=((PAD, PAD), (PAD, PAD)),
        dimension_numbers=("NCHW", "OIHW", "NCHW"))
    conv = conv + params["conv_b"].reshape(1, -1, 1, 1)
    mean = jnp.mean(conv, axis=(0, 2, 3), keepdims=True)
    var = jnp.var(conv, axis=(0, 2, 3), keepdims=True)          # biased
    y = (conv - mean) * jax.lax.rsqrt(var + BN_EPS)
    y = y * params["bn_g"].reshape(1, -1, 1, 1) + params["bn_b"].reshape(1, -1, 1, 1)
    f = jnp.maximum(y, 0.0).reshape(x.shape[0], -1)              # NCHW flatten
    out = f @ params["lin_w"].T + params["lin_b"]
    return jnp.maximum(out, 0.0)


# ---------------------------------------------------------------------------
# Deterministic parameter init (shapes from Embed.__init__)
# ---------------------------------------------------------------------------
def init_params(key, in_channels, embedding_dim, flat_conv_dim):
    k1, k2, k3, k4 = jax.random.split(key, 4)
    fan_in_conv = in_channels * KH * KW
    bc = 1.0 / (fan_in_conv ** 0.5)
    bl = 1.0 / (flat_conv_dim ** 0.5)
    return {
        "conv_w": jax.random.uniform(k1, (ENC_LAYERS, in_channels, KH, KW),
                                     jnp.float32, -bc, bc),
        "conv_b": jax.random.uniform(k2, (ENC_LAYERS,), jnp.float32, -bc, bc),
        "bn_g": jnp.ones((ENC_LAYERS,), jnp.float32),
        "bn_b": jnp.zeros((ENC_LAYERS,), jnp.float32),
        "lin_w": jax.random.uniform(k3, (embedding_dim, flat_conv_dim),
                                    jnp.float32, -bl, bl),
        "lin_b": jax.random.uniform(k4, (embedding_dim,), jnp.float32, -bl, bl),
    }


if __name__ == "__main__":
    key = jax.random.PRNGKey(0)
    kx, kp = jax.random.split(key)

    N, C, H, W = 2, 4, 16, 16
    embedding_dim = 32
    OH = OW = H + 2 * PAD - KH + 1          # 19
    flat_conv_dim = ENC_LAYERS * OH * OW    # 16 * 19 * 19 = 5776

    x = jax.random.normal(kx, (N, C, H, W), jnp.float32)
    params = init_params(kp, C, embedding_dim, flat_conv_dim)
    prepped = prepare_params(params)        # one-time weight layout / bf16 cast

    out = embed_forward(x, prepped, embedding_dim)
    out = jax.block_until_ready(out)
    assert out.shape == (N, embedding_dim) and out.dtype == jnp.float32

    # Loose-tolerance check against an f32 XLA reference (kernel uses bf16
    # MXU operands, so exact equality is not expected).
    ref = _reference_forward(x, params)
    max_err = float(jnp.max(jnp.abs(out - ref)))
    assert max_err < 0.1, f"max abs error vs reference too large: {max_err}"

    print("KERNEL_OK")
</pallas_src>

<mosaic_0001>
module attributes {stable_mosaic.version = 11 : i64} {
  func.func @_fused_embed_kernel(%arg0: memref<16x768xbf16, #tpu.memory_space<vmem>>, %arg1: memref<16x16xbf16, #tpu.memory_space<vmem>>, %arg2: memref<16x1xf32, #tpu.memory_space<vmem>>, %arg3: memref<16x1xf32, #tpu.memory_space<vmem>>, %arg4: memref<6144x128xbf16, #tpu.memory_space<vmem>>, %arg5: memref<1x128xf32, #tpu.memory_space<vmem>>, %arg6: memref<2x128xf32, #tpu.memory_space<vmem>>, %arg7: memref<16x768xbf16, #tpu.memory_space<vmem>>, %arg8: memref<2x6144xbf16, #tpu.memory_space<vmem>>) attributes {dimension_semantics = [], scalar_prefetch = 0 : i64, scratch_operands = 2 : i64, tpu.core_type = #tpu.core_type<tc>} {
    %c0 = arith.constant 0 : index
    %c0_0 = arith.constant 0 : index
    %0 = vector.load %arg1[%c0, %c0_0] : memref<16x16xbf16, #tpu.memory_space<vmem>>, vector<16x16xbf16>
    %c0_1 = arith.constant 0 : index
    %c0_2 = arith.constant 0 : index
    %1 = vector.load %arg0[%c0_1, %c0_2] : memref<16x768xbf16, #tpu.memory_space<vmem>>, vector<16x768xbf16>
    %cst = arith.constant dense<0.000000e+00> : vector<16x768xf32>
    %2 = tpu.matmul %0, %1, %cst {dimension_numbers = #tpu.dot_dimension_numbers<[1], [0], [0], [1], [0, 0, 1, 1], [], []>} : vector<16x16xbf16>, vector<16x768xbf16>, vector<16x768xf32> -> vector<16x768xf32>
    %cst_3 = arith.constant dense<0.000000e+00> : vector<16xf32>
    %3 = vector.multi_reduction <add>, %2, %cst_3 [1] : vector<16x768xf32> to vector<16xf32>
    %4 = vector.shape_cast %3 : vector<16xf32> to vector<16x1xf32>
    %cst_4 = arith.constant 0.00138504151 : f32
    %5 = vector.broadcast %cst_4 : f32 to vector<16x1xf32>
    %6 = arith.mulf %4, %5 : vector<16x1xf32>
    %7 = vector.broadcast %6 : vector<16x1xf32> to vector<16x768xf32>
    %8 = arith.subf %2, %7 : vector<16x768xf32>
    %9 = arith.mulf %8, %8 : vector<16x768xf32>
    %cst_5 = arith.constant dense<0.000000e+00> : vector<16xf32>
    %10 = vector.multi_reduction <add>, %9, %cst_5 [1] : vector<16x768xf32> to vector<16xf32>
    %11 = vector.shape_cast %10 : vector<16xf32> to vector<16x1xf32>
    %12 = arith.mulf %6, %6 : vector<16x1xf32>
    %cst_6 = arith.constant 4.600000e+01 : f32
    %13 = vector.broadcast %cst_6 : f32 to vector<16x1xf32>
    %14 = arith.mulf %13, %12 : vector<16x1xf32>
    %15 = arith.subf %11, %14 : vector<16x1xf32>
    %cst_7 = arith.constant 0.00138504151 : f32
    %16 = vector.broadcast %cst_7 : f32 to vector<16x1xf32>
    %17 = arith.mulf %15, %16 : vector<16x1xf32>
    %cst_8 = arith.constant 0.000000e+00 : f32
    %18 = vector.broadcast %cst_8 : f32 to vector<16x1xf32>
    %19 = arith.maximumf %17, %18 : vector<16x1xf32>
    %cst_9 = arith.constant 9.99999974E-6 : f32
    %20 = vector.broadcast %cst_9 : f32 to vector<16x1xf32>
    %21 = arith.addf %19, %20 : vector<16x1xf32>
    %22 = math.rsqrt %21 : vector<16x1xf32>
    %c0_10 = arith.constant 0 : index
    %c0_11 = arith.constant 0 : index
    %23 = vector.load %arg2[%c0_10, %c0_11] : memref<16x1xf32, #tpu.memory_space<vmem>>, vector<16x1xf32>
    %24 = arith.mulf %22, %23 : vector<16x1xf32>
    %c0_12 = arith.constant 0 : index
    %c0_13 = arith.constant 0 : index
    %25 = vector.load %arg3[%c0_12, %c0_13] : memref<16x1xf32, #tpu.memory_space<vmem>>, vector<16x1xf32>
    %26 = arith.mulf %6, %24 : vector<16x1xf32>
    %27 = arith.subf %25, %26 : vector<16x1xf32>
    %28 = vector.broadcast %24 : vector<16x1xf32> to vector<16x768xf32>
    %29 = arith.mulf %2, %28 : vector<16x768xf32>
    %30 = vector.broadcast %27 : vector<16x1xf32> to vector<16x768xf32>
    %31 = arith.addf %29, %30 : vector<16x768xf32>
    %cst_14 = arith.constant 0.000000e+00 : f32
    %32 = vector.broadcast %cst_14 : f32 to vector<16x768xf32>
    %33 = arith.maximumf %31, %32 : vector<16x768xf32>
    %34 = arith.truncf %33 : vector<16x768xf32> to vector<16x768xbf16>
    %c0_15 = arith.constant 0 : index
    %c0_16 = arith.constant 0 : index
    %35 = vector.load %arg7[%c0_15, %c0_16] : memref<16x768xbf16, #tpu.memory_space<vmem>>, vector<16x768xbf16>
    tpu.vector_store %arg7[%c0_15, %c0_16], %34 {strides = array<i32>} : memref<16x768xbf16, #tpu.memory_space<vmem>>, vector<16x768xbf16>,
    %c0_17 = arith.constant 0 : index
    %c0_18 = arith.constant 0 : index
    %36 = vector.load %arg7[%c0_17, %c0_18] : memref<16x768xbf16, #tpu.memory_space<vmem>>, vector<1x384xbf16>
    %c0_19 = arith.constant 0 : index
    %c0_20 = arith.constant 0 : index
    %37 = vector.load %arg8[%c0_19, %c0_20] : memref<2x6144xbf16, #tpu.memory_space<vmem>>, vector<1x384xbf16>
    tpu.vector_store %arg8[%c0_19, %c0_20], %36 {strides = array<i32>} : memref<2x6144xbf16, #tpu.memory_space<vmem>>, vector<1x384xbf16>,
    %c0_21 = arith.constant 0 : index
    %c384 = arith.constant 384 : index
    %38 = vector.load %arg7[%c0_21, %c384] : memref<16x768xbf16, #tpu.memory_space<vmem>>, vector<1x384xbf16>
    %c1 = arith.constant 1 : index
    %c0_22 = arith.constant 0 : index
    %39 = vector.load %arg8[%c1, %c0_22] : memref<2x6144xbf16, #tpu.memory_space<vmem>>, vector<1x384xbf16>
    tpu.vector_store %arg8[%c1, %c0_22], %38 {strides = array<i32>} : memref<2x6144xbf16, #tpu.memory_space<vmem>>, vector<1x384xbf16>,
    %c1_23 = arith.constant 1 : index
    %c0_24 = arith.constant 0 : index
    %40 = vector.load %arg7[%c1_23, %c0_24] : memref<16x768xbf16, #tpu.memory_space<vmem>>, vector<1x384xbf16>
    %c0_25 = arith.constant 0 : index
    %c384_26 = arith.constant 384 : index
    %41 = vector.load %arg8[%c0_25, %c384_26] : memref<2x6144xbf16, #tpu.memory_space<vmem>>, vector<1x384xbf16>
    tpu.vector_store %arg8[%c0_25, %c384_26], %40 {strides = array<i32>} : memref<2x6144xbf16, #tpu.memory_space<vmem>>, vector<1x384xbf16>,
    %c1_27 = arith.constant 1 : index
    %c384_28 = arith.constant 384 : index
    %42 = vector.load %arg7[%c1_27, %c384_28] : memref<16x768xbf16, #tpu.memory_space<vmem>>, vector<1x384xbf16>
    %c1_29 = arith.constant 1 : index
    %c384_30 = arith.constant 384 : index
    %43 = vector.load %arg8[%c1_29, %c384_30] : memref<2x6144xbf16, #tpu.memory_space<vmem>>, vector<1x384xbf16>
    tpu.vector_store %arg8[%c1_29, %c384_30], %42 {strides = array<i32>} : memref<2x6144xbf16, #tpu.memory_space<vmem>>, vector<1x384xbf16>,
    %c2 = arith.constant 2 : index
    %c0_31 = arith.constant 0 : index
    %44 = vector.load %arg7[%c2, %c0_31] : memref<16x768xbf16, #tpu.memory_space<vmem>>, vector<1x384xbf16>
    %c0_32 = arith.constant 0 : index
    %c768 = arith.constant 768 : index
    %45 = vector.load %arg8[%c0_32, %c768] : memref<2x6144xbf16, #tpu.memory_space<vmem>>, vector<1x384xbf16>
    tpu.vector_store %arg8[%c0_32, %c768], %44 {strides = array<i32>} : memref<2x6144xbf16, #tpu.memory_space<vmem>>, vector<1x384xbf16>,
    %c2_33 = arith.constant 2 : index
    %c384_34 = arith.constant 384 : index
    %46 = vector.load %arg7[%c2_33, %c384_34] : memref<16x768xbf16, #tpu.memory_space<vmem>>, vector<1x384xbf16>
    %c1_35 = arith.constant 1 : index
    %c768_36 = arith.constant 768 : index
    %47 = vector.load %arg8[%c1_35, %c768_36] : memref<2x6144xbf16, #tpu.memory_space<vmem>>, vector<1x384xbf16>
    tpu.vector_store %arg8[%c1_35, %c768_36], %46 {strides = array<i32>} : memref<2x6144xbf16, #tpu.memory_space<vmem>>, vector<1x384xbf16>,
    %c3 = arith.constant 3 : index
    %c0_37 = arith.constant 0 : index
    %48 = vector.load %arg7[%c3, %c0_37] : memref<16x768xbf16, #tpu.memory_space<vmem>>, vector<1x384xbf16>
    %c0_38 = arith.constant 0 : index
    %c1152 = arith.constant 1152 : index
    %49 = vector.load %arg8[%c0_38, %c1152] : memref<2x6144xbf16, #tpu.memory_space<vmem>>, vector<1x384xbf16>
    tpu.vector_store %arg8[%c0_38, %c1152], %48 {strides = array<i32>} : memref<2x6144xbf16, #tpu.memory_space<vmem>>, vector<1x384xbf16>,
    %c3_39 = arith.constant 3 : index
    %c384_40 = arith.constant 384 : index
    %50 = vector.load %arg7[%c3_39, %c384_40] : memref<16x768xbf16, #tpu.memory_space<vmem>>, vector<1x384xbf16>
    %c1_41 = arith.constant 1 : index
    %c1152_42 = arith.constant 1152 : index
    %51 = vector.load %arg8[%c1_41, %c1152_42] : memref<2x6144xbf16, #tpu.memory_space<vmem>>, vector<1x384xbf16>
    tpu.vector_store %arg8[%c1_41, %c1152_42], %50 {strides = array<i32>} : memref<2x6144xbf16, #tpu.memory_space<vmem>>, vector<1x384xbf16>,
    %c4 = arith.constant 4 : index
    %c0_43 = arith.constant 0 : index
    %52 = vector.load %arg7[%c4, %c0_43] : memref<16x768xbf16, #tpu.memory_space<vmem>>, vector<1x384xbf16>
    %c0_44 = arith.constant 0 : index
    %c1536 = arith.constant 1536 : index
    %53 = vector.load %arg8[%c0_44, %c1536] : memref<2x6144xbf16, #tpu.memory_space<vmem>>, vector<1x384xbf16>
    tpu.vector_store %arg8[%c0_44, %c1536], %52 {strides = array<i32>} : memref<2x6144xbf16, #tpu.memory_space<vmem>>, vector<1x384xbf16>,
    %c4_45 = arith.constant 4 : index
    %c384_46 = arith.constant 384 : index
    %54 = vector.load %arg7[%c4_45, %c384_46] : memref<16x768xbf16, #tpu.memory_space<vmem>>, vector<1x384xbf16>
    %c1_47 = arith.constant 1 : index
    %c1536_48 = arith.constant 1536 : index
    %55 = vector.load %arg8[%c1_47, %c1536_48] : memref<2x6144xbf16, #tpu.memory_space<vmem>>, vector<1x384xbf16>
    tpu.vector_store %arg8[%c1_47, %c1536_48], %54 {strides = array<i32>} : memref<2x6144xbf16, #tpu.memory_space<vmem>>, vector<1x384xbf16>,
    %c5 = arith.constant 5 : index
    %c0_49 = arith.constant 0 : index
    %56 = vector.load %arg7[%c5, %c0_49] : memref<16x768xbf16, #tpu.memory_space<vmem>>, vector<1x384xbf16>
    %c0_50 = arith.constant 0 : index
    %c1920 = arith.constant 1920 : index
    %57 = vector.load %arg8[%c0_50, %c1920] : memref<2x6144xbf16, #tpu.memory_space<vmem>>, vector<1x384xbf16>
    tpu.vector_store %arg8[%c0_50, %c1920], %56 {strides = array<i32>} : memref<2x6144xbf16, #tpu.memory_space<vmem>>, vector<1x384xbf16>,
    %c5_51 = arith.constant 5 : index
    %c384_52 = arith.constant 384 : index
    %58 = vector.load %arg7[%c5_51, %c384_52] : memref<16x768xbf16, #tpu.memory_space<vmem>>, vector<1x384xbf16>
    %c1_53 = arith.constant 1 : index
    %c1920_54 = arith.constant 1920 : index
    %59 = vector.load %arg8[%c1_53, %c1920_54] : memref<2x6144xbf16, #tpu.memory_space<vmem>>, vector<1x384xbf16>
    tpu.vector_store %arg8[%c1_53, %c1920_54], %58 {strides = array<i32>} : memref<2x6144xbf16, #tpu.memory_space<vmem>>, vector<1x384xbf16>,
    %c6 = arith.constant 6 : index
    %c0_55 = arith.constant 0 : index
    %60 = vector.load %arg7[%c6, %c0_55] : memref<16x768xbf16, #tpu.memory_space<vmem>>, vector<1x384xbf16>
    %c0_56 = arith.constant 0 : index
    %c2304 = arith.constant 2304 : index
    %61 = vector.load %arg8[%c0_56, %c2304] : memref<2x6144xbf16, #tpu.memory_space<vmem>>, vector<1x384xbf16>
    tpu.vector_store %arg8[%c0_56, %c2304], %60 {strides = array<i32>} : memref<2x6144xbf16, #tpu.memory_space<vmem>>, vector<1x384xbf16>,
    %c6_57 = arith.constant 6 : index
    %c384_58 = arith.constant 384 : index
    %62 = vector.load %arg7[%c6_57, %c384_58] : memref<16x768xbf16, #tpu.memory_space<vmem>>, vector<1x384xbf16>
    %c1_59 = arith.constant 1 : index
    %c2304_60 = arith.constant 2304 : index
    %63 = vector.load %arg8[%c1_59, %c2304_60] : memref<2x6144xbf16, #tpu.memory_space<vmem>>, vector<1x384xbf16>
    tpu.vector_store %arg8[%c1_59, %c2304_60], %62 {strides = array<i32>} : memref<2x6144xbf16, #tpu.memory_space<vmem>>, vector<1x384xbf16>,
    %c7 = arith.constant 7 : index
    %c0_61 = arith.constant 0 : index
    %64 = vector.load %arg7[%c7, %c0_61] : memref<16x768xbf16, #tpu.memory_space<vmem>>, vector<1x384xbf16>
    %c0_62 = arith.constant 0 : index
    %c2688 = arith.constant 2688 : index
    %65 = vector.load %arg8[%c0_62, %c2688] : memref<2x6144xbf16, #tpu.memory_space<vmem>>, vector<1x384xbf16>
    tpu.vector_store %arg8[%c0_62, %c2688], %64 {strides = array<i32>} : memref<2x6144xbf16, #tpu.memory_space<vmem>>, vector<1x384xbf16>,
    %c7_63 = arith.constant 7 : index
    %c384_64 = arith.constant 384 : index
    %66 = vector.load %arg7[%c7_63, %c384_64] : memref<16x768xbf16, #tpu.memory_space<vmem>>, vector<1x384xbf16>
    %c1_65 = arith.constant 1 : index
    %c2688_66 = arith.constant 2688 : index
    %67 = vector.load %arg8[%c1_65, %c2688_66] : memref<2x6144xbf16, #tpu.memory_space<vmem>>, vector<1x384xbf16>
    tpu.vector_store %arg8[%c1_65, %c2688_66], %66 {strides = array<i32>} : memref<2x6144xbf16, #tpu.memory_space<vmem>>, vector<1x384xbf16>,
    %c8 = arith.constant 8 : index
    %c0_67 = arith.constant 0 : index
    %68 = vector.load %arg7[%c8, %c0_67] : memref<16x768xbf16, #tpu.memory_space<vmem>>, vector<1x384xbf16>
    %c0_68 = arith.constant 0 : index
    %c3072 = arith.constant 3072 : index
    %69 = vector.load %arg8[%c0_68, %c3072] : memref<2x6144xbf16, #tpu.memory_space<vmem>>, vector<1x384xbf16>
    tpu.vector_store %arg8[%c0_68, %c3072], %68 {strides = array<i32>} : memref<2x6144xbf16, #tpu.memory_space<vmem>>, vector<1x384xbf16>,
    %c8_69 = arith.constant 8 : index
    %c384_70 = arith.constant 384 : index
    %70 = vector.load %arg7[%c8_69, %c384_70] : memref<16x768xbf16, #tpu.memory_space<vmem>>, vector<1x384xbf16>
    %c1_71 = arith.constant 1 : index
    %c3072_72 = arith.constant 3072 : index
    %71 = vector.load %arg8[%c1_71, %c3072_72] : memref<2x6144xbf16, #tpu.memory_space<vmem>>, vector<1x384xbf16>
    tpu.vector_store %arg8[%c1_71, %c3072_72], %70 {strides = array<i32>} : memref<2x6144xbf16, #tpu.memory_space<vmem>>, vector<1x384xbf16>,
    %c9 = arith.constant 9 : index
    %c0_73 = arith.constant 0 : index
    %72 = vector.load %arg7[%c9, %c0_73] : memref<16x768xbf16, #tpu.memory_space<vmem>>, vector<1x384xbf16>
    %c0_74 = arith.constant 0 : index
    %c3456 = arith.constant 3456 : index
    %73 = vector.load %arg8[%c0_74, %c3456] : memref<2x6144xbf16, #tpu.memory_space<vmem>>, vector<1x384xbf16>
    tpu.vector_store %arg8[%c0_74, %c3456], %72 {strides = array<i32>} : memref<2x6144xbf16, #tpu.memory_space<vmem>>, vector<1x384xbf16>,
    %c9_75 = arith.constant 9 : index
    %c384_76 = arith.constant 384 : index
    %74 = vector.load %arg7[%c9_75, %c384_76] : memref<16x768xbf16, #tpu.memory_space<vmem>>, vector<1x384xbf16>
    %c1_77 = arith.constant 1 : index
    %c3456_78 = arith.constant 3456 : index
    %75 = vector.load %arg8[%c1_77, %c3456_78] : memref<2x6144xbf16, #tpu.memory_space<vmem>>, vector<1x384xbf16>
    tpu.vector_store %arg8[%c1_77, %c3456_78], %74 {strides = array<i32>} : memref<2x6144xbf16, #tpu.memory_space<vmem>>, vector<1x384xbf16>,
    %c10 = arith.constant 10 : index
    %c0_79 = arith.constant 0 : index
    %76 = vector.load %arg7[%c10, %c0_79] : memref<16x768xbf16, #tpu.memory_space<vmem>>, vector<1x384xbf16>
    %c0_80 = arith.constant 0 : index
    %c3840 = arith.constant 3840 : index
    %77 = vector.load %arg8[%c0_80, %c3840] : memref<2x6144xbf16, #tpu.memory_space<vmem>>, vector<1x384xbf16>
    tpu.vector_store %arg8[%c0_80, %c3840], %76 {strides = array<i32>} : memref<2x6144xbf16, #tpu.memory_space<vmem>>, vector<1x384xbf16>,
    %c10_81 = arith.constant 10 : index
    %c384_82 = arith.constant 384 : index
    %78 = vector.load %arg7[%c10_81, %c384_82] : memref<16x768xbf16, #tpu.memory_space<vmem>>, vector<1x384xbf16>
    %c1_83 = arith.constant 1 : index
    %c3840_84 = arith.constant 3840 : index
    %79 = vector.load %arg8[%c1_83, %c3840_84] : memref<2x6144xbf16, #tpu.memory_space<vmem>>, vector<1x384xbf16>
    tpu.vector_store %arg8[%c1_83, %c3840_84], %78 {strides = array<i32>} : memref<2x6144xbf16, #tpu.memory_space<vmem>>, vector<1x384xbf16>,
    %c11 = arith.constant 11 : index
    %c0_85 = arith.constant 0 : index
    %80 = vector.load %arg7[%c11, %c0_85] : memref<16x768xbf16, #tpu.memory_space<vmem>>, vector<1x384xbf16>
    %c0_86 = arith.constant 0 : index
    %c4224 = arith.constant 4224 : index
    %81 = vector.load %arg8[%c0_86, %c4224] : memref<2x6144xbf16, #tpu.memory_space<vmem>>, vector<1x384xbf16>
    tpu.vector_store %arg8[%c0_86, %c4224], %80 {strides = array<i32>} : memref<2x6144xbf16, #tpu.memory_space<vmem>>, vector<1x384xbf16>,
    %c11_87 = arith.constant 11 : index
    %c384_88 = arith.constant 384 : index
    %82 = vector.load %arg7[%c11_87, %c384_88] : memref<16x768xbf16, #tpu.memory_space<vmem>>, vector<1x384xbf16>
    %c1_89 = arith.constant 1 : index
    %c4224_90 = arith.constant 4224 : index
    %83 = vector.load %arg8[%c1_89, %c4224_90] : memref<2x6144xbf16, #tpu.memory_space<vmem>>, vector<1x384xbf16>
    tpu.vector_store %arg8[%c1_89, %c4224_90], %82 {strides = array<i32>} : memref<2x6144xbf16, #tpu.memory_space<vmem>>, vector<1x384xbf16>,
    %c12 = arith.constant 12 : index
    %c0_91 = arith.constant 0 : index
    %84 = vector.load %arg7[%c12, %c0_91] : memref<16x768xbf16, #tpu.memory_space<vmem>>, vector<1x384xbf16>
    %c0_92 = arith.constant 0 : index
    %c4608 = arith.constant 4608 : index
    %85 = vector.load %arg8[%c0_92, %c4608] : memref<2x6144xbf16, #tpu.memory_space<vmem>>, vector<1x384xbf16>
    tpu.vector_store %arg8[%c0_92, %c4608], %84 {strides = array<i32>} : memref<2x6144xbf16, #tpu.memory_space<vmem>>, vector<1x384xbf16>,
    %c12_93 = arith.constant 12 : index
    %c384_94 = arith.constant 384 : index
    %86 = vector.load %arg7[%c12_93, %c384_94] : memref<16x768xbf16, #tpu.memory_space<vmem>>, vector<1x384xbf16>
    %c1_95 = arith.constant 1 : index
    %c4608_96 = arith.constant 4608 : index
    %87 = vector.load %arg8[%c1_95, %c4608_96] : memref<2x6144xbf16, #tpu.memory_space<vmem>>, vector<1x384xbf16>
    tpu.vector_store %arg8[%c1_95, %c4608_96], %86 {strides = array<i32>} : memref<2x6144xbf16, #tpu.memory_space<vmem>>, vector<1x384xbf16>,
    %c13 = arith.constant 13 : index
    %c0_97 = arith.constant 0 : index
    %88 = vector.load %arg7[%c13, %c0_97] : memref<16x768xbf16, #tpu.memory_space<vmem>>, vector<1x384xbf16>
    %c0_98 = arith.constant 0 : index
    %c4992 = arith.constant 4992 : index
    %89 = vector.load %arg8[%c0_98, %c4992] : memref<2x6144xbf16, #tpu.memory_space<vmem>>, vector<1x384xbf16>
    tpu.vector_store %arg8[%c0_98, %c4992], %88 {strides = array<i32>} : memref<2x6144xbf16, #tpu.memory_space<vmem>>, vector<1x384xbf16>,
    %c13_99 = arith.constant 13 : index
    %c384_100 = arith.constant 384 : index
    %90 = vector.load %arg7[%c13_99, %c384_100] : memref<16x768xbf16, #tpu.memory_space<vmem>>, vector<1x384xbf16>
    %c1_101 = arith.constant 1 : index
    %c4992_102 = arith.constant 4992 : index
    %91 = vector.load %arg8[%c1_101, %c4992_102] : memref<2x6144xbf16, #tpu.memory_space<vmem>>, vector<1x384xbf16>
    tpu.vector_store %arg8[%c1_101, %c4992_102], %90 {strides = array<i32>} : memref<2x6144xbf16, #tpu.memory_space<vmem>>, vector<1x384xbf16>,
    %c14 = arith.constant 14 : index
    %c0_103 = arith.constant 0 : index
    %92 = vector.load %arg7[%c14, %c0_103] : memref<16x768xbf16, #tpu.memory_space<vmem>>, vector<1x384xbf16>
    %c0_104 = arith.constant 0 : index
    %c5376 = arith.constant 5376 : index
    %93 = vector.load %arg8[%c0_104, %c5376] : memref<2x6144xbf16, #tpu.memory_space<vmem>>, vector<1x384xbf16>
    tpu.vector_store %arg8[%c0_104, %c5376], %92 {strides = array<i32>} : memref<2x6144xbf16, #tpu.memory_space<vmem>>, vector<1x384xbf16>,
    %c14_105 = arith.constant 14 : index
    %c384_106 = arith.constant 384 : index
    %94 = vector.load %arg7[%c14_105, %c384_106] : memref<16x768xbf16, #tpu.memory_space<vmem>>, vector<1x384xbf16>
    %c1_107 = arith.constant 1 : index
    %c5376_108 = arith.constant 5376 : index
    %95 = vector.load %arg8[%c1_107, %c5376_108] : memref<2x6144xbf16, #tpu.memory_space<vmem>>, vector<1x384xbf16>
    tpu.vector_store %arg8[%c1_107, %c5376_108], %94 {strides = array<i32>} : memref<2x6144xbf16, #tpu.memory_space<vmem>>, vector<1x384xbf16>,
    %c15 = arith.constant 15 : index
    %c0_109 = arith.constant 0 : index
    %96 = vector.load %arg7[%c15, %c0_109] : memref<16x768xbf16, #tpu.memory_space<vmem>>, vector<1x384xbf16>
    %c0_110 = arith.constant 0 : index
    %c5760 = arith.constant 5760 : index
    %97 = vector.load %arg8[%c0_110, %c5760] : memref<2x6144xbf16, #tpu.memory_space<vmem>>, vector<1x384xbf16>
    tpu.vector_store %arg8[%c0_110, %c5760], %96 {strides = array<i32>} : memref<2x6144xbf16, #tpu.memory_space<vmem>>, vector<1x384xbf16>,
    %c15_111 = arith.constant 15 : index
    %c384_112 = arith.constant 384 : index
    %98 = vector.load %arg7[%c15_111, %c384_112] : memref<16x768xbf16, #tpu.memory_space<vmem>>, vector<1x384xbf16>
    %c1_113 = arith.constant 1 : index
    %c5760_114 = arith.constant 5760 : index
    %99 = vector.load %arg8[%c1_113, %c5760_114] : memref<2x6144xbf16, #tpu.memory_space<vmem>>, vector<1x384xbf16>
    tpu.vector_store %arg8[%c1_113, %c5760_114], %98 {strides = array<i32>} : memref<2x6144xbf16, #tpu.memory_space<vmem>>, vector<1x384xbf16>,
    %c0_115 = arith.constant 0 : index
    %c0_116 = arith.constant 0 : index
    %100 = vector.load %arg8[%c0_115, %c0_116] : memref<2x6144xbf16, #tpu.memory_space<vmem>>, vector<2x6144xbf16>
    %c0_117 = arith.constant 0 : index
    %c0_118 = arith.constant 0 : index
    %101 = vector.load %arg4[%c0_117, %c0_118] : memref<6144x128xbf16, #tpu.memory_space<vmem>>, vector<6144x128xbf16>
    %cst_119 = arith.constant dense<0.000000e+00> : vector<2x128xf32>
    %102 = tpu.matmul %100, %101, %cst_119 {dimension_numbers = #tpu.dot_dimension_numbers<[1], [0], [0], [1], [0, 0, 1, 1], [], []>} : vector<2x6144xbf16>, vector<6144x128xbf16>, vector<2x128xf32> -> vector<2x128xf32>
    %c0_120 = arith.constant 0 : index
    %c0_121 = arith.constant 0 : index
    %103 = vector.load %arg5[%c0_120, %c0_121] : memref<1x128xf32, #tpu.memory_space<vmem>>, vector<1x128xf32>
    %104 = vector.broadcast %103 : vector<1x128xf32> to vector<2x128xf32>
    %105 = arith.addf %102, %104 : vector<2x128xf32>
    %cst_122 = arith.constant 0.000000e+00 : f32
    %106 = vector.broadcast %cst_122 : f32 to vector<2x128xf32>
    %107 = arith.maximumf %105, %106 : vector<2x128xf32>
    %c0_123 = arith.constant 0 : index
    %c0_124 = arith.constant 0 : index
    %108 = vector.load %arg6[%c0_123, %c0_124] : memref<2x128xf32, #tpu.memory_space<vmem>>, vector<2x128xf32>
    tpu.vector_store %arg6[%c0_123, %c0_124], %107 {strides = array<i32>} : memref<2x128xf32, #tpu.memory_space<vmem>>, vector<2x128xf32>,
    return
  }
}

</mosaic_0001>

<bundles_post_ra>
// kernel: embed_forward.1
= control target key start
LH: loop header
LB: loop body
LE: loop exit
PB: predicated region body
PF: predicated region fallthrough
CT: control target
= control target key end

     0   :  { %v7355_v2 = vmov 0   ;;  %vm68_vm0 = vcmask 130048   ;;  %s8979_s0 = inlined_call_operand.vmem [shape: bf16[16,768], index: 0, kind: input, shape index: {}]   ;;  %s8980_s1 = inlined_call_operand.vmem [shape: bf16[16,16], index: 1, kind: input, shape index: {}]   ;;  %s8981_s2 = inlined_call_operand.vmem [shape: f32[16,1], index: 2, kind: input, shape index: {}]   ;;  %s8982_s3 = inlined_call_operand.vmem [shape: f32[16,1], index: 3, kind: input, shape index: {}]   ;;  %s8983_s4 = inlined_call_operand.vmem [shape: bf16[6144,128], index: 4, kind: input, shape index: {}]   ;;  %s8984_s5 = inlined_call_operand.vmem [shape: f32[1,128], index: 5, kind: input, shape index: {}]   ;;  %s8985_s6 = inlined_call_operand.hbm [shape: f32[2,128], index: 6, kind: output, shape index: {}]  }
   0x1   :  { %v6879_v0 = vld [vmem:[%s8979_s0 + $0x4] ss:$24 sps:$4 sm:$0xff]   ;;  %v6881_v1 = vld [vmem:[%s8979_s0] ss:$24 sps:$4 sm:$0xff]   ;;  %104 = vmatprep.mubr.bf16.mxu0 %v7355_v2  ;;  %147 = vmatprep.mubr.bf16.mxu1 %v7355_v2  ;;  %v6886_v6 = vld [vmem:[%s8979_s0 + $0x10] ss:$24 sps:$4 sm:$0xff]  }
   0x2   :  { %72 = vmatprep.subr.bf16.mxu0 %v6879_v0  ;;  %v6882_v3 = vld [vmem:[%s8979_s0 + $0xc] ss:$24 sps:$4 sm:$0xff]   ;;  %v6884_v4 = vld [vmem:[%s8979_s0 + $0x8] ss:$24 sps:$4 sm:$0xff]   ;;  %6877 = vset.pattern.permute.xlu0 %v7355_v2 }
   0x3   :  { %73 = vmatpush1.bf16.msra.mxu0 %v6881_v1  ;;  %v6885_v5 = vld [vmem:[%s8980_s1] sm:$0xff]   ;;  %6878 = vset.pattern.permute.xlu1 %v7355_v2  ;;  %v6888_v7 = vld [vmem:[%s8979_s0 + $0x14] ss:$24 sps:$4 sm:$0xff]  }
   0x4   :  { %115 = vmatprep.subr.bf16.mxu1 %v6882_v3  ;;  %158 = vmatprep.subr.bf16.mxu0 %v6888_v7 }
   0x5   :  { %116 = vmatpush1.bf16.msra.mxu1 %v6884_v4 }
   0x6   :  { %5934 = vmatmul.mubr.msk.bf16.vlgmr.msra.gmra.mrb[0].mxu0 %vm68_vm0, %v6885_v5 }
   0x7   :  { %159 = vmatpush1.bf16.msra.mxu0 %v6886_v6  ;;  %190 = vmatprep.mubr.bf16.mxu0 %v7355_v2 }
   0x8   :  { %5935 = vmatmul.mubr.msk.bf16.vlgmr.msra.gmra.mrb[0].mxu1 %vm68_vm0, %v6885_v5 }
   0xe   :  { %5936 = vmatmul.mubr.msk.bf16.vlgmr.msra.gmra.mrb[4].mxu0 %vm68_vm0, %v6885_v5 }
  0xd9   :  { %v7414_v8 = vpop.f32.mrb[0].mxu0 }
  0xda   :  { %v7416_v9 = vpop.f32.mrb[1].mxu0 }
  0xdb   :  { %v201_v10 = vadd.f32 %v7416_v9, %v7414_v8  ;;  %v7420_v11 = vpop.f32.mrb[2].mxu0  ;;  %v7422_v12 = vpop.f32.mrb[0].mxu1 }
  0xdc   :  { %v7424_v13 = vpop.f32.mrb[3].mxu0  ;;  %v7426_v14 = vpop.f32.mrb[1].mxu1 }
  0xdd   :  { %v202_v15 = vadd.f32 %v201_v10, %v7422_v12  ;;  %v208_v16 = vadd.f32 %v7424_v13, %v7420_v11  ;;  %v7431_v17 = vpop.f32.mrb[2].mxu1 }
  0xde   :  { %v7433_v18 = vpop.f32.mrb[3].mxu1 }
  0xdf   :  { %v203_v19 = vadd.f32 %v202_v15, %v7426_v14  ;;  %v209_v20 = vadd.f32 %v208_v16, %v7431_v17 }
  0xe1   :  { %v210_v21 = vadd.f32 %v209_v20, %v7433_v18  ;;  %v7438_v22 = vpop.f32.mrb[4].mxu0 }
  0xe2   :  { %v7440_v23 = vpop.f32.mrb[5].mxu0  ;;  %v204_v24 = vadd.f32 %v203_v19, %v7438_v22 }
  0xe3   :  { %v7443_v25 = vpop.f32.mrb[6].mxu0 }
  0xe4   :  { %v7445_v26 = vpop.f32.mrb[7].mxu0  ;;  %v205_v27 = vadd.f32 %v204_v24, %v7440_v23  ;;  %v211_v28 = vadd.f32 %v210_v21, %v7443_v25 }
  0xe6   :  { %206 = vadd.xlane.f32.xlu0 %v205_v27  ;;  %v212_v29 = vadd.f32 %v211_v28, %v7445_v26 }
  0xea   :  { %213 = vadd.xlane.f32.xlu0 %v212_v29 }
  0xeb   :  { %11 = vsyncpa [#allocation5], 0  ;;  %vm377_vm1 = vcmask 1040384   ;;  %vm378_vm2 = vsmask.f32 256  ;;  %vm380_vm3 = vcmask 1041409  }
  0xec   :  { %vm381_vm4 = vsmask.f32 1280  ;;  %vm7589_vm5 = vmand %vm377_vm1, %vm378_vm2  ;;  %vm384_vm7 = vcmask 1042434   ;;  %vm385_vm8 = vsmask.f32 2304 }
  0xed   :  { %vm7594_vm6 = vmand %vm380_vm3, %vm381_vm4  ;;  %vm424_vm12 = vsmask.f32 7938  ;;  %vm426_vm13 = vsmask.f32 7942  ;;  %vm429_vm14 = vsmask.f32 7946 }
  0xee   :  { %vm383_vm9 = vmor %vm7594_vm6, %vm7589_vm5 }
  0xef   :  { %vm386_vm10 = vmand %vm384_vm7, %vm385_vm8 }
  0xf0   :  { %vm7608_vm11 = vmor %vm386_vm10, %vm383_vm9 }
  0xf1   :  { %vm7664_vm15 = vmand %vm377_vm1, %vm424_vm12 }
  0xf2   :  { %vm7672_vm0 = vmand %vm380_vm3, %vm426_vm13 }
  0xf3   :  { %vm428_vm1 = vmor %vm7672_vm0, %vm7664_vm15 }
  0xf4   :  { %vm7692_vm2 = vmand %vm384_vm7, %vm429_vm14 }
  0xf5   :  { %vm7711_vm3 = vmor %vm7692_vm2, %vm428_vm1 }
 0x173   :  { %v207_v30 = vpop.xlane.xlu0 %206 }
 0x174   :  { %v215_v31 = vmul.f32 0.0013850415, %v207_v30  ;;  %v269_v30 = vld [vmem:[%s8981_s2] sm:$0xff] }
 0x176   :  { %v217_v32 = vsub.f32 %v7414_v8, %v215_v31  ;;  %v218_v33 = vsub.f32 %v7416_v9, %v215_v31  ;;  %v219_v34 = vsub.f32 %v7422_v12, %v215_v31  ;;  %v220_v36 = vsub.f32 %v7426_v14, %v215_v31 }
 0x177   :  { %v214_v35 = vpop.xlane.xlu0 %213  ;;  %v221_v40 = vsub.f32 %v7438_v22, %v215_v31  ;;  %v222_v46 = vsub.f32 %v7440_v23, %v215_v31  ;;  %v255_v4 = vmul.f32 %v215_v31, %v215_v31 }
 0x178   :  { %v216_v37 = vmul.f32 0.0013850415, %v214_v35  ;;  %v229_v38 = vmul.f32 %v217_v32, %v217_v32  ;;  %v230_v39 = vmul.f32 %v218_v33, %v218_v33  ;;  %v231_v41 = vmul.f32 %v219_v34, %v219_v34  ;;  %v270_v34 = vld [vmem:[%s8981_s2 + $0x8] sm:$0xff] }
 0x179   :  { %v232_v47 = vmul.f32 %v220_v36, %v220_v36  ;;  %v233_v52 = vmul.f32 %v221_v40, %v221_v40  ;;  %v234_v57 = vmul.f32 %v222_v46, %v222_v46  ;;  %v257_v5 = vmul.f32 46.0, %v255_v4  ;;  %v6941_v46 = vld [vmem:[%s8983_s4 + $0x48] sm:$0xff]   ;;  %v6962_v4 = vld [vmem:[%s8983_s4 + $0x30] sm:$0xff]  }
 0x17a   :  { %v241_v42 = vadd.f32 %v230_v39, %v229_v38  ;;  %v223_v43 = vsub.f32 %v7420_v11, %v216_v37  ;;  %v224_v44 = vsub.f32 %v7424_v13, %v216_v37  ;;  %v225_v45 = vsub.f32 %v7431_v17, %v216_v37  ;;  %v273_v39 = vld [vmem:[%s8982_s3] sm:$0xff] }
 0x17b   :  { %v226_v49 = vsub.f32 %v7433_v18, %v216_v37  ;;  %v227_v54 = vsub.f32 %v7443_v25, %v216_v37  ;;  %v228_v59 = vsub.f32 %v7445_v26, %v216_v37  ;;  %v256_v6 = vmul.f32 %v216_v37, %v216_v37 }
 0x17c   :  { %v242_v48 = vadd.f32 %v241_v42, %v231_v41  ;;  %v235_v50 = vmul.f32 %v223_v43, %v223_v43  ;;  %v236_v51 = vmul.f32 %v224_v44, %v224_v44  ;;  %v237_v55 = vmul.f32 %v225_v45, %v225_v45  ;;  %v274_v42 = vld [vmem:[%s8982_s3 + $0x8] sm:$0xff]  ;;  %v6937_v44 = vld [vmem:[%s8983_s4 + $0x40] sm:$0xff]  }
 0x17d   :  { %v238_v60 = vmul.f32 %v226_v49, %v226_v49  ;;  %v239_v63 = vmul.f32 %v227_v54, %v227_v54  ;;  %v240_v1 = vmul.f32 %v228_v59, %v228_v59  ;;  %v258_v16 = vmul.f32 46.0, %v256_v6  ;;  %6346 = vmatprep.subr.bf16.mxu1 %v6937_v44  ;;  %v6940_v45 = vld [vmem:[%s8983_s4 + $0x80] sm:$0xff]   ;;  %v6944_v49 = vld [vmem:[%s8983_s4 + $0x88] sm:$0xff]   ;;  %v6948_v54 = vld [vmem:[%s8983_s4 + $0x90] sm:$0xff]  }
 0x17e   :  { %v243_v53 = vadd.f32 %v242_v48, %v232_v47  ;;  %v248_v56 = vadd.f32 %v236_v51, %v235_v50  ;;  %v6942_v47 = vld [vmem:[%s8983_s4 + $0x8] sm:$0xff]   ;;  %v6945_v50 = vld [vmem:[%s8983_s4 + $0x50] sm:$0xff]   ;;  %v6955_v59 = vld [vmem:[%s8983_s4 + $0xe0] sm:$0xff]  }
 0x17f   :  { %v6943_v48 = vld [vmem:[%s8983_s4 + $0xc8] sm:$0xff]   ;;  %v6946_v51 = vld [vmem:[%s8983_s4 + $0x10] sm:$0xff]  }
 0x180   :  { %v244_v58 = vadd.f32 %v243_v53, %v233_v52  ;;  %v249_v61 = vadd.f32 %v248_v56, %v237_v55  ;;  %v6947_v52 = vld [vmem:[%s8983_s4 + $0xd0] sm:$0xff]   ;;  %v6949_v53 = vld [vmem:[%s8983_s4 + $0x58] sm:$0xff]  }
 0x181   :  { %v6951_v55 = vld [vmem:[%s8983_s4 + $0xd8] sm:$0xff]   ;;  %v6964_v6 = vld [vmem:[%s8983_s4 + $0xb0] sm:$0xff]  }
 0x182   :  { %v245_v62 = vadd.f32 %v244_v58, %v234_v57  ;;  %v250_v0 = vadd.f32 %v249_v61, %v238_v60  ;;  %v6950_v56 = vld [vmem:[%s8983_s4 + $0x18] sm:$0xff]   ;;  %v6953_v57 = vld [vmem:[%s8983_s4 + $0x60] sm:$0xff]   ;;  %v6957_v61 = vld [vmem:[%s8983_s4 + $0x68] sm:$0xff]  }
 0x183   :  { %v6952_v58 = vld [vmem:[%s8983_s4 + $0x98] sm:$0xff]   ;;  %v6954_v60 = vld [vmem:[%s8983_s4 + $0x20] sm:$0xff]  }
 0x184   :  { %246 = vadd.xlane.f32.xlu1 %v245_v62  ;;  %v251_v2 = vadd.f32 %v250_v0, %v239_v63  ;;  %v6956_v62 = vld [vmem:[%s8983_s4 + $0xa0] sm:$0xff]   ;;  %v6959_v63 = vld [vmem:[%s8983_s4 + $0xe8] sm:$0xff]  }
 0x185   :  { %v6958_v0 = vld [vmem:[%s8983_s4 + $0x28] sm:$0xff]  }
 0x186   :  { %v252_v3 = vadd.f32 %v251_v2, %v240_v1  ;;  %v6961_v1 = vld [vmem:[%s8983_s4 + $0x70] sm:$0xff]   ;;  %v6960_v2 = vld [vmem:[%s8983_s4 + $0xa8] sm:$0xff]  }
 0x188   :  { %253 = vadd.xlane.f32.xlu1 %v252_v3  ;;  %v6963_v3 = vld [vmem:[%s8983_s4 + $0xf0] sm:$0xff]  }
 0x211   :  { %v247_v7 = vpop.xlane.xlu1 %246 }
 0x212   :  { %v259_v10 = vsub.f32 %v247_v7, %v257_v5  ;;  %v6965_v5 = vld [vmem:[%s8983_s4 + $0x78] sm:$0xff]  }
 0x213   :  { %v6967_v7 = vld [vmem:[%s8983_s4 + $0xf8] sm:$0xff]  }
 0x214   :  { %v261_v15 = vmul.f32 0.0013850415, %v259_v10  ;;  %v6966_v10 = vld [vmem:[%s8983_s4 + $0x38] sm:$0xff]  }
 0x215   :  { %v254_v19 = vpop.xlane.xlu1 %253 }
 0x216   :  { %v263_v20 = vmax.f32 %v261_v15, 0.0  ;;  %v260_v21 = vsub.f32 %v254_v19, %v258_v16  ;;  %v6969_v15 = vld [vmem:[%s8983_s4 + $0x140] sm:$0xff]   ;;  %v6968_v16 = vld [vmem:[%s8983_s4 + $0xb8] sm:$0xff]  }
 0x217   :  { %v6972_v19 = vld [vmem:[%s8983_s4 + $0x1c0] sm:$0xff]  }
 0x218   :  { %v265_v24 = vadd.f32 1e-05, %v263_v20  ;;  %v262_v27 = vmul.f32 0.0013850415, %v260_v21 }
 0x21a   :  { %7327 = vrsqrt.f32 %v265_v24  ;;  %v264_v28 = vmax.f32 %v262_v27, 0.0 }
 0x21c   :  { %v266_v29 = vadd.f32 1e-05, %v264_v28 }
 0x21e   :  { %7329 = vrsqrt.f32 %v266_v29 }
 0x224   :  { %v7328_v32 = vpop.eup %7327 }
 0x225   :  { %v271_v33 = vmul.f32 %v7328_v32, %v269_v30 }
 0x227   :  { %281 = vperm.xlu0 %6877, %v271_v33   ;;  %v275_v38 = vmul.f32 %v271_v33, %v215_v31  ;;  %v6938_v31 = vld [vmem:[%s8983_s4] sm:$0xff]  }
 0x228   :  { %v7330_v35 = vpop.eup %7329  ;;  %6347 = vmatpush3.bf16.msra.mxu1 %v6938_v31 }
 0x229   :  { %v272_v36 = vmul.f32 %v7330_v35, %v270_v34  ;;  %v277_v40 = vsub.f32 %v273_v39, %v275_v38  ;;  %6348 = vmatprep.subr.bf16.mxu1 %v6941_v46 }
 0x22b   :  { %286 = vperm.xlu1 %6878, %v272_v36   ;;  %v276_v41 = vmul.f32 %v272_v36, %v216_v37  ;;  %v6939_v37 = vld [vmem:[%s8983_s4 + $0xc0] sm:$0xff]  }
 0x22c   :  { %6368 = vmatprep.subr.bf16.mxu0 %v6939_v37  ;;  %6349 = vmatpush3.bf16.msra.mxu1 %v6942_v47 }
 0x22d   :  { %v278_v43 = vsub.f32 %v274_v42, %v276_v41  ;;  %6369 = vmatpush3.bf16.msra.mxu0 %v6940_v45  ;;  %6350 = vmatprep.subr.bf16.mxu1 %v6945_v50 }
 0x22e   :  { %6370 = vmatprep.subr.bf16.mxu0 %v6943_v48 }
 0x22f   :  { %303 = vperm.xlu1 %6878, %v277_v40  }
 0x230   :  { %6351 = vmatpush3.bf16.msra.mxu1 %v6946_v51 }
 0x231   :  { %6371 = vmatpush3.bf16.msra.mxu0 %v6944_v49  ;;  %6352 = vmatprep.subr.bf16.mxu1 %v6949_v53 }
 0x232   :  { %6372 = vmatprep.subr.bf16.mxu0 %v6947_v52 }
 0x233   :  { %308 = vperm.xlu1 %6878, %v278_v43  }
 0x234   :  { %6353 = vmatpush3.bf16.msra.mxu1 %v6950_v56  ;;  %v7356_v56 = vmov 1966171168  }
 0x235   :  { %6373 = vmatpush3.bf16.msra.mxu0 %v6948_v54  ;;  %6354 = vmatprep.subr.bf16.mxu1 %v6953_v57  ;;  %v355_v57 = vunpack.c.l.s4 %v7356_v56 }
 0x236   :  { %6374 = vmatprep.subr.bf16.mxu0 %v6951_v55 }
 0x238   :  { %6355 = vmatpush3.bf16.msra.mxu1 %v6954_v60 }
 0x239   :  { %6375 = vmatpush3.bf16.msra.mxu0 %v6952_v58  ;;  %6356 = vmatprep.subr.bf16.mxu1 %v6957_v61  ;;  %v357_v58 = vlaneseq  ;;  %v356_v61 = vunpack.c.0.s8 %v355_v57 }
 0x23a   :  { %6376 = vmatprep.subr.bf16.mxu0 %v6955_v59 }
 0x23c   :  { %6357 = vmatpush3.bf16.msra.mxu1 %v6958_v0 }
 0x23d   :  { %6377 = vmatpush3.bf16.msra.mxu0 %v6956_v62  ;;  %6358 = vmatprep.subr.bf16.mxu1 %v6961_v1  ;;  %v358_v62 = vshrl.u32 %v357_v58, 7 }
 0x23e   :  { %6378 = vmatprep.subr.bf16.mxu0 %v6959_v63 }
 0x23f   :  { %v7598_v1 = vsub.s32 %v356_v61, %v358_v62 }
 0x240   :  { %6359 = vmatpush3.bf16.msra.mxu1 %v6962_v4 }
 0x241   :  { %6379 = vmatpush3.bf16.msra.mxu0 %v6960_v2  ;;  %6360 = vmatprep.subr.bf16.mxu1 %v6965_v5 }
 0x242   :  { %6380 = vmatprep.subr.bf16.mxu0 %v6963_v3 }
 0x244   :  { %6361 = vmatpush3.bf16.msra.mxu1 %v6966_v10  ;;  %v388_v10 = vld [vmem:[#allocation3] sm:$0x7] }
 0x245   :  { %6381 = vmatpush3.bf16.msra.mxu0 %v6964_v6  ;;  %6390 = vmatprep.subr.bf16.mxu1 %v6969_v15 }
 0x246   :  { %6382 = vmatprep.subr.bf16.mxu0 %v6967_v7 }
 0x249   :  { %6383 = vmatpush3.bf16.msra.mxu0 %v6968_v16 }
 0x24a   :  { %6412 = vmatprep.subr.bf16.mxu0 %v6972_v19 }
 0x2a6   :  { %v282_v20 = vpop.permute.xlu0 %281 }
 0x2a7   :  { %v289_v24 = vmul.f32 %v282_v20, %v7414_v8  ;;  %v290_v27 = vmul.f32 %v282_v20, %v7416_v9  ;;  %v291_v28 = vmul.f32 %v282_v20, %v7422_v12  ;;  %v292_v29 = vmul.f32 %v282_v20, %v7426_v14 }
 0x2a8   :  { %v293_v32 = vmul.f32 %v282_v20, %v7438_v22  ;;  %v294_v33 = vmul.f32 %v282_v20, %v7440_v23 }
 0x2aa   :  { %v287_v21 = vpop.permute.xlu1 %286 }
 0x2ab   :  { %v295_v39 = vmul.f32 %v287_v21, %v7420_v11  ;;  %v296_v40 = vmul.f32 %v287_v21, %v7424_v13  ;;  %v297_v8 = vmul.f32 %v287_v21, %v7431_v17  ;;  %v298_v9 = vmul.f32 %v287_v21, %v7433_v18 }
 0x2ac   :  { %v299_v12 = vmul.f32 %v287_v21, %v7443_v25  ;;  %v300_v14 = vmul.f32 %v287_v21, %v7445_v26  ;;  %v470_v21 = vld [vmem:[#allocation3 + $0x3] sm:$0x7] }
 0x2ae   :  { %v304_v30 = vpop.permute.xlu1 %303 }
 0x2af   :  { %v311_v34 = vadd.f32 %v304_v30, %v289_v24  ;;  %v312_v35 = vadd.f32 %v304_v30, %v290_v27  ;;  %v313_v36 = vadd.f32 %v304_v30, %v291_v28  ;;  %v314_v38 = vadd.f32 %v304_v30, %v292_v29 }
 0x2b0   :  { %v315_v41 = vadd.f32 %v304_v30, %v293_v32  ;;  %v316_v22 = vadd.f32 %v304_v30, %v294_v33 }
 0x2b1   :  { %v323_v42 = vmax.f32 %v311_v34, 0.0  ;;  %v324_v23 = vmax.f32 %v312_v35, 0.0  ;;  %v325_v11 = vmax.f32 %v313_v36, 0.0  ;;  %v326_v46 = vmax.f32 %v314_v38, 0.0  ;;  %v536_v34 = vld [vmem:[#allocation3 + $0x6] sm:$0x7] }
 0x2b2   :  { %v309_v43 = vpop.permute.xlu1 %308  ;;  %v327_v25 = vmax.f32 %v315_v41, 0.0  ;;  %v328_v50 = vmax.f32 %v316_v22, 0.0 }
 0x2b3   :  { %v317_v44 = vadd.f32 %v309_v43, %v295_v39  ;;  %v318_v31 = vadd.f32 %v309_v43, %v296_v40  ;;  %v319_v37 = vadd.f32 %v309_v43, %v297_v8  ;;  %v320_v45 = vadd.f32 %v309_v43, %v298_v9 }
 0x2b4   :  { %v321_v13 = vadd.f32 %v309_v43, %v299_v12  ;;  %v322_v47 = vadd.f32 %v309_v43, %v300_v14  ;;  %v610_v43 = vld [vmem:[#allocation3 + $0x9] sm:$0x7] }
 0x2b5   :  { %v329_v17 = vmax.f32 %v317_v44, 0.0  ;;  %v330_v48 = vmax.f32 %v318_v31, 0.0  ;;  %v331_v18 = vmax.f32 %v319_v37, 0.0  ;;  %v332_v49 = vmax.f32 %v320_v45, 0.0 }
 0x2b6   :  { %v333_v26 = vmax.f32 %v321_v13, 0.0  ;;  %v334_v51 = vmax.f32 %v322_v47, 0.0 }
 0x2b7   :  { %v335_v52 = vpack.c.bf16 %v329_v17, %v323_v42  ;;  %v336_v53 = vpack.c.bf16 %v330_v48, %v324_v23  ;;  %v337_v54 = vpack.c.bf16 %v331_v18, %v325_v11  ;;  %v338_v55 = vpack.c.bf16 %v332_v49, %v326_v46  ;;  %v677_v11 = vld [vmem:[#allocation3 + $0xc] sm:$0x7] }
 0x2b8   :  { %v339_v59 = vpack.c.bf16 %v333_v26, %v327_v25  ;;  %v340_v60 = vpack.c.bf16 %v334_v51, %v328_v50  ;;  %v753_v26 = vld [vmem:[#allocation3 + $0xf] sm:$0x7] }
 0x2b9   :  { %341 = vst [vmem:[#allocation2] sm:$0xff] %v335_v52  ;;  %342 = vst [vmem:[#allocation2 + $0x8] sm:$0xff] %v336_v53 }
 0x2ba   :  { %343 = vst [vmem:[#allocation2 + $0x10] sm:$0xff] %v337_v54  ;;  %344 = vst [vmem:[#allocation2 + $0x18] sm:$0xff] %v338_v55 }
 0x2bb   :  { %345 = vst [vmem:[#allocation2 + $0x20] sm:$0xff] %v339_v59  ;;  %346 = vst [vmem:[#allocation2 + $0x28] sm:$0xff] %v340_v60  ;;  %v821_v60 = vld [vmem:[#allocation3 + $0x12] sm:$0x7] }
 0x2c0   :  { %v6889_v2 = vld [vmem:[#allocation2] ss:$8 sps:$4 sm:$0x11]   ;;  %v6893_v19 = vld [vmem:[#allocation2] ss:$8 sps:$4 sm:$0x22]  }
 0x2c1   :  { %v5937_v3 = vld.sshfl [vmem:[#allocation2 + $0x10] sm:$0x1 pattern:$0x75316420]  ;;  %v360_v4 = vrot.slane %v6889_v2, %v7598_v1  ;;  %v519_v28 = vrot.slane %v6893_v19, %v7598_v1 }
 0x2c2   :  { %v6891_v5 = vld [vmem:[#allocation2] ss:$8 sps:$4 sm:$0x11]   ;;  %v6895_v29 = vld [vmem:[#allocation2] ss:$8 sps:$4 sm:$0x22]  }
 0x2c3   :  { %v368_v6 = vcombine.low %v360_v4, %v5937_v3  ;;  %v448_v7 = vrot.slane %v6891_v5, %v7598_v1  ;;  %v5942_v27 = vld.sshfl [vmem:[#allocation2 + $0x10] sm:$0x10 pattern:$0x75316420]  ;;  %v588_v35 = vrot.slane %v6895_v29, %v7598_v1  ;;  %v897_v4 = vld [vmem:[#allocation3 + $0x15] sm:$0x7] }
 0x2c4   :  { %v527_v33 = vcombine.high %v519_v28, %v5942_v27  ;;  %v6897_v40 = vld [vmem:[#allocation2] ss:$8 sps:$4 sm:$0x44]   ;;  %v6901_v37 = vld [vmem:[#allocation2] ss:$8 sps:$4 sm:$0x88]  }
 0x2c5   :  { %v375_v15 = vrot.slane %v368_v6, %v7598_v1  ;;  %v456_v16 = vcombine.low %v448_v7, %v5937_v3  ;;  %v596_v39 = vcombine.high %v588_v35, %v5942_v27  ;;  %v5947_v8 = vld.sshfl [vmem:[#allocation2 + $0x10] sm:$0x2 pattern:$0x75316420]  ;;  %v659_v14 = vrot.slane %v6897_v40, %v7598_v1  ;;  %v965_v7 = vld [vmem:[#allocation3 + $0x18] sm:$0x7] }
 0x2c6   :  { %v534_v36 = vrot.slane %v527_v33, %v7598_v1  ;;  %v6899_v41 = vld [vmem:[#allocation2] ss:$8 sps:$4 sm:$0x44]   ;;  %v803_v17 = vrot.slane %v6901_v37, %v7598_v1  ;;  %v6903_v48 = vld [vmem:[#allocation2] ss:$8 sps:$4 sm:$0x88]  }
 0x2c7   :  { %v463_v24 = vrot.slane %v456_v16, %v7598_v1  ;;  %v389_v30 = vsel %vm7608_vm11, %v375_v15, %v388_v10  ;;  %v603_v12 = vrot.slane %v596_v39, %v7598_v1  ;;  %v667_v42 = vcombine.low %v659_v14, %v5947_v8  ;;  %v5952_v47 = vld.sshfl [vmem:[#allocation2 + $0x10] sm:$0x20 pattern:$0x75316420]  ;;  %v1041_v33 = vld [vmem:[#allocation3 + $0x1b] sm:$0x7] }
 0x2c8   :  { %390 = vst [vmem:[#allocation3] sm:$0x7] %v389_v30  ;;  %v537_v9 = vsel %vm7608_vm11, %v534_v36, %v536_v34  ;;  %v730_v23 = vrot.slane %v6899_v41, %v7598_v1  ;;  %v811_v49 = vcombine.high %v803_v17, %v5952_v47  ;;  %v874_v25 = vrot.slane %v6903_v48, %v7598_v1  ;;  %v6905_v54 = vld [vmem:[#allocation2 + $0x4] ss:$8 sps:$4 sm:$0x11]  }
 0x2c9   :  { %v465_v32 = vshrl.u32 %v463_v24, 16  ;;  %538 = vst [vmem:[#allocation3 + $0x6] sm:$0x7] %v537_v9  ;;  %v605_v22 = vshrl.u32 %v603_v12, 16  ;;  %v674_v44 = vrot.slane %v667_v42, %v7598_v1  ;;  %v948_v59 = vrot.slane %v6905_v54, %v7598_v1  ;;  %v1109_v35 = vld [vmem:[#allocation3 + $0x1e] sm:$0x7] }
 0x2ca   :  { %v738_v31 = vcombine.low %v730_v23, %v5947_v8  ;;  %v818_v52 = vrot.slane %v811_v49, %v7598_v1  ;;  %v882_v53 = vcombine.high %v874_v25, %v5952_v47  ;;  %v6906_v55 = vld [vmem:[#allocation2 + $0x14] ss:$0 sps:$4 sm:$0x11]   ;;  %v6909_v63 = vld [vmem:[#allocation2 + $0x4] ss:$8 sps:$4 sm:$0x11]  }
 0x2cb   :  { %v471_v38 = vsel %vm7608_vm11, %v465_v32, %v470_v21  ;;  %v611_v45 = vsel %vm7608_vm11, %v605_v22, %v610_v43  ;;  %v675_v46 = vcombine.high %v674_v44, %v674_v44  ;;  %v955_v61 = vrot.slane %v6906_v55, %v7598_v1  ;;  %v6910_v0 = vld [vmem:[#allocation2 + $0x14] ss:$0 sps:$4 sm:$0x11]   ;;  %v6913_v21 = vld [vmem:[#allocation2 + $0x4] ss:$8 sps:$4 sm:$0x22]  }
 0x2cc   :  { %472 = vst [vmem:[#allocation3 + $0x3] sm:$0x7] %v471_v38  ;;  %v745_v13 = vrot.slane %v738_v31, %v7598_v1  ;;  %612 = vst [vmem:[#allocation3 + $0x9] sm:$0x7] %v611_v45  ;;  %v819_v57 = vcombine.high %v818_v52, %v818_v52  ;;  %v889_v58 = vrot.slane %v882_v53, %v7598_v1  ;;  %v1402_v54 = vld [vmem:[#allocation3 + $0x2a] sm:$0x7] }
 0x2cd   :  { %v678_v50 = vsel %vm7608_vm11, %v675_v46, %v677_v11  ;;  %v956_v2 = vcombine.low %v948_v59, %v955_v61  ;;  %v1019_v6 = vrot.slane %v6909_v63, %v7598_v1  ;;  %v1026_v15 = vrot.slane %v6910_v0, %v7598_v1  ;;  %v6914_v24 = vld [vmem:[#allocation2 + $0x14] ss:$0 sps:$4 sm:$0x22]   ;;  %v6890_v28 = vld [vmem:[#allocation2 + $0x18] ss:$8 sps:$4 sm:$0x11]  }
 0x2ce   :  { %v746_v18 = vcombine.high %v745_v13, %v745_v13  ;;  %679 = vst [vmem:[#allocation3 + $0xc] sm:$0x7] %v678_v50  ;;  %v890_v62 = vcombine.high %v889_v58, %v889_v58  ;;  %v822_v3 = vsel %vm7608_vm11, %v819_v57, %v821_v60  ;;  %v1092_v30 = vrot.slane %v6913_v21, %v7598_v1  ;;  %v6898_v34 = vld [vmem:[#allocation2 + $0x18] ss:$8 sps:$4 sm:$0x44]  }
 0x2cf   :  { %823 = vst [vmem:[#allocation3 + $0x12] sm:$0x7] %v822_v3  ;;  %v963_v10 = vrot.slane %v956_v2, %v7598_v1  ;;  %v1027_v19 = vcombine.low %v1019_v6, %v1026_v15  ;;  %v1099_v32 = vrot.slane %v6914_v24, %v7598_v1  ;;  %v6917_v39 = vld [vmem:[#allocation2 + $0x4] ss:$8 sps:$4 sm:$0x22]   ;;  %v404_v41 = vrot.slane %v6890_v28, %v7598_v1 }
 0x2d0   :  { %v748_v51 = vshrl.u32 %v746_v18, 16  ;;  %v892_v5 = vshrl.u32 %v890_v62, 16  ;;  %v6918_v40 = vld [vmem:[#allocation2 + $0x14] ss:$0 sps:$4 sm:$0x22]   ;;  %v1163_v12 = vrot.slane %v6917_v39, %v7598_v1  ;;  %v693_v45 = vrot.slane %v6898_v34, %v7598_v1 }
 0x2d1   :  { %v966_v27 = vsel %vm7608_vm11, %v963_v10, %v965_v7  ;;  %v1034_v29 = vrot.slane %v1027_v19, %v7598_v1  ;;  %v1100_v38 = vcombine.high %v1092_v30, %v1099_v32  ;;  %v6894_v8 = vld [vmem:[#allocation2 + $0x18] ss:$8 sps:$4 sm:$0x22]   ;;  %v6900_v22 = vld [vmem:[#allocation2 + $0x18] ss:$8 sps:$4 sm:$0x44]   ;;  %v1170_v42 = vrot.slane %v6918_v40, %v7598_v1 }
 0x2d2   :  { %v754_v56 = vsel %vm7608_vm11, %v748_v51, %v753_v26  ;;  %v898_v16 = vsel %vm7608_vm11, %v892_v5, %v897_v4  ;;  %967 = vst [vmem:[#allocation3 + $0x18] sm:$0x7] %v966_v27  ;;  %v5938_v23 = vld.sshfl [vmem:[#allocation2 + $0x28] sm:$0x1 pattern:$0x75316420]  ;;  %v552_v25 = vrot.slane %v6894_v8, %v7598_v1 }
 0x2d3   :  { %755 = vst [vmem:[#allocation3 + $0xf] sm:$0x7] %v754_v56  ;;  %899 = vst [vmem:[#allocation3 + $0x15] sm:$0x7] %v898_v16  ;;  %v1036_v36 = vshrl.u32 %v1034_v29, 16  ;;  %v1107_v9 = vrot.slane %v1100_v38, %v7598_v1  ;;  %v1171_v11 = vcombine.high %v1163_v12, %v1170_v42  ;;  %v412_v49 = vcombine.low %v404_v41, %v5938_v23  ;;  %v6991_v12 = vld [vmem:[%s8983_s4 + $0x128] sm:$0xff]  }
 0x2d4   :  { %v6892_v43 = vld [vmem:[#allocation2 + $0x18] ss:$8 sps:$4 sm:$0x11]   ;;  %v6921_v44 = vld [vmem:[#allocation2 + $0x4] ss:$8 sps:$4 sm:$0x44]   ;;  %v769_v56 = vrot.slane %v6900_v22, %v7598_v1 }
 0x2d5   :  { %v1042_v14 = vsel %vm7608_vm11, %v1036_v36, %v1041_v33  ;;  %v6922_v31 = vld [vmem:[#allocation2 + $0x14] ss:$0 sps:$4 sm:$0x44]   ;;  %v1110_v37 = vsel %vm7608_vm11, %v1107_v9, %v1109_v35  ;;  %v6896_v46 = vld [vmem:[#allocation2 + $0x18] ss:$8 sps:$4 sm:$0x22]   ;;  %v1236_v47 = vrot.slane %v6921_v44, %v7598_v1  ;;  %v1178_v50 = vrot.slane %v1171_v11, %v7598_v1 }
 0x2d6   :  { %1043 = vst [vmem:[#allocation3 + $0x1b] sm:$0x7] %v1042_v14  ;;  %1111 = vst [vmem:[#allocation3 + $0x1e] sm:$0x7] %v1110_v37  ;;  %v1243_v17 = vrot.slane %v6922_v31, %v7598_v1  ;;  %v1185_v18 = vld [vmem:[#allocation3 + $0x21] sm:$0x7]  ;;  %v486_v58 = vrot.slane %v6892_v43, %v7598_v1  ;;  %v419_v63 = vrot.slane %v412_v49, %v7598_v1 }
 0x2d7   :  { %v5948_v13 = vld.sshfl [vmem:[#allocation2 + $0x28] sm:$0x2 pattern:$0x75316420]  ;;  %v1180_v57 = vshrl.u32 %v1178_v50, 16  ;;  %v626_v4 = vrot.slane %v6896_v46, %v7598_v1 }
 0x2d8   :  { %v5943_v26 = vld.sshfl [vmem:[#allocation2 + $0x28] sm:$0x10 pattern:$0x75316420]  ;;  %v1244_v51 = vcombine.low %v1236_v47, %v1243_v17  ;;  %v701_v55 = vcombine.low %v693_v45, %v5948_v13  ;;  %v1254_v3 = vld [vmem:[#allocation3 + $0x24] sm:$0x7]  ;;  %v777_v10 = vcombine.low %v769_v56, %v5948_v13  ;;  %v494_v21 = vcombine.low %v486_v58, %v5938_v23 }
 0x2d9   :  { %v6925_v52 = vld [vmem:[#allocation2 + $0x4] ss:$8 sps:$4 sm:$0x44]   ;;  %v6926_v53 = vld [vmem:[#allocation2 + $0x14] ss:$0 sps:$4 sm:$0x44]   ;;  %v560_v0 = vcombine.high %v552_v25, %v5943_v26  ;;  %v1186_v2 = vsel %vm7608_vm11, %v1180_v57, %v1185_v18  ;;  %v634_v35 = vcombine.high %v626_v4, %v5943_v26 }
 0x2da   :  { %v6902_v59 = vld [vmem:[#allocation2 + $0x18] ss:$8 sps:$4 sm:$0x88]   ;;  %v1251_v60 = vrot.slane %v1244_v51, %v7598_v1  ;;  %v1309_v61 = vrot.slane %v6925_v52, %v7598_v1  ;;  %v1316_v62 = vrot.slane %v6926_v53, %v7598_v1  ;;  %1187 = vst [vmem:[#allocation3 + $0x21] sm:$0x7] %v1186_v2  ;;  %v708_v7 = vrot.slane %v701_v55, %v7598_v1 }
 0x2db   :  { %v6929_v15 = vld [vmem:[#allocation2 + $0x4] ss:$8 sps:$4 sm:$0x88]   ;;  %v6930_v16 = vld [vmem:[#allocation2 + $0x14] ss:$0 sps:$4 sm:$0x88]   ;;  %v837_v24 = vrot.slane %v6902_v59, %v7598_v1  ;;  %v567_v29 = vrot.slane %v560_v0, %v7598_v1  ;;  %v784_v39 = vrot.slane %v777_v10, %v7598_v1  ;;  %v501_v14 = vrot.slane %v494_v21, %v7598_v1 }
 0x2dc   :  { %v1252_v5 = vcombine.high %v1251_v60, %v1251_v60  ;;  %v1317_v6 = vcombine.low %v1309_v61, %v1316_v62  ;;  %v421_v28 = vshll.u32 %v419_v63, 16  ;;  %v5953_v30 = vld.sshfl [vmem:[#allocation2 + $0x28] sm:$0x20 pattern:$0x75316420]  ;;  %v1384_v33 = vrot.slane %v6929_v15, %v7598_v1 }
 0x2dd   :  { %v6904_v32 = vld [vmem:[#allocation2 + $0x18] ss:$8 sps:$4 sm:$0x88]   ;;  %v1391_v34 = vrot.slane %v6930_v16, %v7598_v1  ;;  %v709_v38 = vcombine.high %v708_v7, %v708_v7  ;;  %v6933_v8 = vld [vmem:[#allocation2 + $0x4] ss:$8 sps:$4 sm:$0x88]   ;;  %v845_v41 = vcombine.high %v837_v24, %v5953_v30  ;;  %v641_v31 = vrot.slane %v634_v35, %v7598_v1 }
 0x2de   :  { %v1255_v27 = vsel %vm7608_vm11, %v1252_v5, %v1254_v3  ;;  %v1324_v36 = vrot.slane %v1317_v6, %v7598_v1  ;;  %v6934_v9 = vld [vmem:[#allocation2 + $0x14] ss:$0 sps:$4 sm:$0x88]   ;;  %v432_v22 = vld [vmem:[#allocation3] sm:$0x7]  ;;  %v569_v42 = vshll.u32 %v567_v29, 16  ;;  %v1457_v43 = vrot.slane %v6933_v8, %v7598_v1 }
 0x2df   :  { %1256 = vst [vmem:[#allocation3 + $0x24] sm:$0x7] %v1255_v27  ;;  %v1392_v40 = vcombine.high %v1384_v33, %v1391_v34  ;;  %v1464_v44 = vrot.slane %v6934_v9, %v7598_v1  ;;  %v913_v37 = vrot.slane %v6904_v32, %v7598_v1  ;;  %v433_v11 = vsel %vm7711_vm3, %v421_v28, %v432_v22  ;;  %v503_v46 = vld [vmem:[#allocation3 + $0x3] sm:$0x7]  ;;  %v572_v13 = vld [vmem:[#allocation3 + $0x6] sm:$0x7] }
 0x2e0   :  { %v1325_v45 = vcombine.high %v1324_v36, %v1324_v36  ;;  %v643_v47 = vld [vmem:[#allocation3 + $0x9] sm:$0x7]  ;;  %v711_v17 = vshll.u32 %v709_v38, 16  ;;  %v785_v48 = vcombine.high %v784_v39, %v784_v39  ;;  %434 = vst [vmem:[#allocation3] sm:$0x7] %v433_v11  ;;  %v852_v26 = vrot.slane %v845_v41, %v7598_v1 }
 0x2e1   :  { %v1399_v23 = vrot.slane %v1392_v40, %v7598_v1  ;;  %v1465_v49 = vcombine.high %v1457_v43, %v1464_v44  ;;  %v714_v25 = vld [vmem:[#allocation3 + $0xc] sm:$0x7]  ;;  %v787_v50 = vld [vmem:[#allocation3 + $0xf] sm:$0x7]  ;;  %v504_v51 = vsel %vm7711_vm3, %v501_v14, %v503_v46  ;;  %v573_v52 = vsel %vm7711_vm3, %v569_v42, %v572_v13  ;;  %v1332_v58 = vld [vmem:[#allocation3 + $0x27] sm:$0x7] }
 0x2e2   :  { %v644_v53 = vsel %vm7711_vm3, %v641_v31, %v643_v47  ;;  %505 = vst [vmem:[#allocation3 + $0x3] sm:$0x7] %v504_v51  ;;  %574 = vst [vmem:[#allocation3 + $0x6] sm:$0x7] %v573_v52  ;;  %v715_v56 = vsel %vm7711_vm3, %v711_v17, %v714_v25  ;;  %v788_v57 = vsel %vm7711_vm3, %v785_v48, %v787_v50  ;;  %v1327_v60 = vshrl.u32 %v1325_v45, 16  ;;  %v6970_v47 = vld [vmem:[%s8983_s4 + $0x100] sm:$0xff]  }
 0x2e3   :  { %v1400_v18 = vcombine.high %v1399_v23, %v1399_v23  ;;  %v1472_v55 = vrot.slane %v1465_v49, %v7598_v1  ;;  %645 = vst [vmem:[#allocation3 + $0x9] sm:$0x7] %v644_v53  ;;  %v921_v59 = vcombine.high %v913_v37, %v5953_v30  ;;  %716 = vst [vmem:[#allocation3 + $0xc] sm:$0x7] %v715_v56  ;;  %v1480_v3 = vld [vmem:[#allocation3 + $0x2d] sm:$0x7] }
 0x2e4   :  { %789 = vst [vmem:[#allocation3 + $0xf] sm:$0x7] %v788_v57  ;;  %v853_v63 = vcombine.high %v852_v26, %v852_v26  ;;  %v6923_v0 = vld [vmem:[#allocation2 + $0x1c] ss:$8 sps:$4 sm:$0x44]   ;;  %v1333_v2 = vsel %vm7608_vm11, %v1327_v60, %v1332_v58  ;;  %v6976_v60 = vld [vmem:[%s8983_s4 + $0x1c8] sm:$0xff]  }
 0x2e5   :  { %v1473_v61 = vcombine.high %v1472_v55, %v1472_v55  ;;  %v1403_v62 = vsel %vm7608_vm11, %v1400_v18, %v1402_v54  ;;  %v6907_v4 = vld [vmem:[#allocation2 + $0x1c] ss:$8 sps:$4 sm:$0x11]   ;;  %v6924_v5 = vld [vmem:[#allocation2 + $0x2c] ss:$0 sps:$4 sm:$0x44]   ;;  %v928_v7 = vrot.slane %v921_v59, %v7598_v1  ;;  %v1271_v29 = vrot.slane %v6923_v0, %v7598_v1 }
 0x2e6   :  { %1404 = vst [vmem:[#allocation3 + $0x2a] sm:$0x7] %v1403_v62  ;;  %1334 = vst [vmem:[#allocation3 + $0x27] sm:$0x7] %v1333_v2  ;;  %v855_v24 = vshll.u32 %v853_v63, 16  ;;  %v1278_v30 = vrot.slane %v6924_v5, %v7598_v1  ;;  %v982_v8 = vrot.slane %v6907_v4, %v7598_v1  ;;  %v6973_v54 = vld [vmem:[%s8983_s4 + $0x180] sm:$0xff]  }
 0x2e7   :  { %v1475_v6 = vshrl.u32 %v1473_v61, 16  ;;  %v6931_v10 = vld [vmem:[#allocation2 + $0x1c] ss:$8 sps:$4 sm:$0x88]   ;;  %v929_v36 = vcombine.high %v928_v7, %v928_v7  ;;  %v858_v20 = vld [vmem:[#allocation3 + $0x12] sm:$0x7] }
 0x2e8   :  { %v6932_v15 = vld [vmem:[#allocation2 + $0x2c] ss:$0 sps:$4 sm:$0x88]   ;;  %v6915_v19 = vld [vmem:[#allocation2 + $0x1c] ss:$8 sps:$4 sm:$0x22]   ;;  %v1419_v38 = vrot.slane %v6931_v10, %v7598_v1  ;;  %v859_v42 = vsel %vm7711_vm3, %v855_v24, %v858_v20  ;;  %v1279_v46 = vcombine.low %v1271_v29, %v1278_v30 }
 0x2e9   :  { %v6908_v16 = vld [vmem:[#allocation2 + $0x2c] ss:$0 sps:$4 sm:$0x11]   ;;  %v1481_v21 = vsel %vm7608_vm11, %v1475_v6, %v1480_v3  ;;  %v1518_v28 = vld [vmem:[#allocation3] sm:$0xff]  ;;  %v1426_v39 = vrot.slane %v6932_v15, %v7598_v1  ;;  %v931_v40 = vld [vmem:[#allocation3 + $0x15] sm:$0x7]  ;;  %v1126_v31 = vrot.slane %v6915_v19, %v7598_v1 }
 0x2ea   :  { %v6916_v27 = vld [vmem:[#allocation2 + $0x2c] ss:$0 sps:$4 sm:$0x22]   ;;  %1482 = vst [vmem:[#allocation3 + $0x2d] sm:$0x7] %v1481_v21  ;;  %v2312_v34 = vrot.slane %v1518_v28, %v7598_v1  ;;  %v2305_v35 = vcombine.high %v1518_v28, %v1518_v28  ;;  %v989_v23 = vrot.slane %v6908_v16, %v7598_v1  ;;  %v932_v45 = vsel %vm7711_vm3, %v929_v36, %v931_v40  ;;  %v6978_v5 = vld [vmem:[%s8983_s4 + $0x150] sm:$0xff]  }
 0x2eb   :  { %v6927_v32 = vld [vmem:[#allocation2 + $0x1c] ss:$8 sps:$4 sm:$0x44]   ;;  %v6928_v33 = vld [vmem:[#allocation2 + $0x2c] ss:$0 sps:$4 sm:$0x44]   ;;  %v1133_v11 = vrot.slane %v6916_v27, %v7598_v1  ;;  %v1427_v50 = vcombine.high %v1419_v38, %v1426_v39  ;;  %v1286_v62 = vrot.slane %v1279_v46, %v7598_v1 }
 0x2ec   :  { %v6935_v9 = vld [vmem:[#allocation2 + $0x1c] ss:$8 sps:$4 sm:$0x88]   ;;  %v6936_v14 = vld [vmem:[#allocation2 + $0x2c] ss:$0 sps:$4 sm:$0x88]   ;;  %v2320_v41 = vcombine.high %v2312_v34, %v2312_v34  ;;  %v7749_v22 = vrot.slane %v2305_v35, %v7598_v1  ;;  %v2328_v37 = vrot.slane %v2312_v34, %v7598_v1  ;;  %v1349_v49 = vrot.slane %v6927_v32, %v7598_v1 }
 0x2ed   :  { %v6911_v43 = vld [vmem:[#allocation2 + $0x1c] ss:$8 sps:$4 sm:$0x11]   ;;  %v6912_v44 = vld [vmem:[#allocation2 + $0x2c] ss:$0 sps:$4 sm:$0x11]   ;;  %v1356_v25 = vrot.slane %v6928_v33, %v7598_v1  ;;  %v1497_v26 = vrot.slane %v6935_v9, %v7598_v1  ;;  %v1504_v51 = vrot.slane %v6936_v14, %v7598_v1  ;;  %v990_v56 = vcombine.low %v982_v8, %v989_v23 }
 0x2ee   :  { %860 = vst [vmem:[#allocation3 + $0x12] sm:$0x7] %v859_v42  ;;  %v2342_v13 = vrot.slane %v2320_v41, %v7598_v1  ;;  %v2321_v17 = vcombine.high %v7749_v22, %v7749_v22  ;;  %933 = vst [vmem:[#allocation3 + $0x15] sm:$0x7] %v932_v45  ;;  %v6974_v55 = vld [vmem:[%s8983_s4 + $0x148] sm:$0xff]   ;;  %v1058_v57 = vrot.slane %v6911_v43, %v7598_v1  ;;  %v6980_v19 = vld [vmem:[%s8983_s4 + $0x1d0] sm:$0xff]  }
 0x2ef   :  { %v6919_v48 = vld [vmem:[#allocation2 + $0x1c] ss:$8 sps:$4 sm:$0x22]   ;;  %v6920_v18 = vld [vmem:[#allocation2 + $0x2c] ss:$0 sps:$4 sm:$0x22]   ;;  %v1065_v58 = vrot.slane %v6912_v44, %v7598_v1  ;;  %v2350_v59 = vcombine.high %v2328_v37, %v2328_v37  ;;  %v1134_v61 = vcombine.high %v1126_v31, %v1133_v11  ;;  %v1357_v4 = vcombine.low %v1349_v49, %v1356_v25 }
 0x2f0   :  { %4983 = vmatprep.mubr.bf16.mxu1 %v2342_v13  ;;  %v2352_v52 = vcombine.high %v2342_v13, %v2342_v13  ;;  %v2349_v53 = vrot.slane %v2321_v17, %v7598_v1  ;;  %v6975_v0 = vld [vmem:[%s8983_s4 + $0x108] sm:$0xff]   ;;  %v1202_v2 = vrot.slane %v6919_v48, %v7598_v1  ;;  %v1209_v3 = vrot.slane %v6920_v18, %v7598_v1  ;;  %v6979_v24 = vld [vmem:[%s8983_s4 + $0x110] sm:$0xff]   ;;  %v6982_v30 = vld [vmem:[%s8983_s4 + $0x158] sm:$0xff]  }
 0x2f1   :  { %4984 = vmatmul.mubr.bf16.vlgmr.msra.gmra.mrb[4].mxu1 %v2328_v37  ;;  %v1434_v6 = vrot.slane %v1427_v50, %v7598_v1  ;;  %v1505_v7 = vcombine.high %v1497_v26, %v1504_v51  ;;  %v6977_v10 = vld [vmem:[%s8983_s4 + $0x188] sm:$0xff]   ;;  %v997_v15 = vrot.slane %v990_v56, %v7598_v1  ;;  %v1066_v16 = vcombine.low %v1058_v57, %v1065_v58  ;;  %v6981_v33 = vld [vmem:[%s8983_s4 + $0x190] sm:$0xff]   ;;  %v6984_v35 = vld [vmem:[%s8983_s4 + $0x1d8] sm:$0xff]  }
 0x2f2   :  { %6391 = vmatpush3.bf16.msra.mxu1 %v6970_v47  ;;  %5023 = vmatprep.mubr.bf16.mxu0 %v2352_v52  ;;  %v2353_v63 = vcombine.high %v2349_v53, %v2349_v53  ;;  %v1141_v21 = vrot.slane %v1134_v61, %v7598_v1  ;;  %v1287_v27 = vcombine.high %v1286_v62, %v1286_v62  ;;  %v1002_v38 = vld [vmem:[#allocation3 + $0x18] sm:$0x7]  ;;  %v6983_v20 = vld [vmem:[%s8983_s4 + $0x118] sm:$0xff]   ;;  %v6986_v40 = vld [vmem:[%s8983_s4 + $0x160] sm:$0xff]  }
 0x2f3   :  { %5063 = vmatprep.mubr.bf16.mxu1 %v2349_v53  ;;  %5024 = vmatmul.mubr.bf16.vlgmr.msra.gmra.mrb[8].mxu0 %v2350_v59  ;;  %v1210_v28 = vcombine.high %v1202_v2, %v1209_v3  ;;  %v1364_v29 = vrot.slane %v1357_v4, %v7598_v1  ;;  %v1512_v32 = vrot.slane %v1505_v7, %v7598_v1  ;;  %v999_v36 = vshll.u32 %v997_v15, 16  ;;  %v1075_v8 = vld [vmem:[#allocation3 + $0x1b] sm:$0x7]  ;;  %v1146_v23 = vld [vmem:[#allocation3 + $0x1e] sm:$0x7]  ;;  %v6985_v45 = vld [vmem:[%s8983_s4 + $0x198] sm:$0xff]  }
 0x2f4   :  { %6413 = vmatpush3.bf16.msra.mxu0 %v6973_v54  ;;  %6392 = vmatprep.subr.bf16.mxu1 %v6974_v55  ;;  %v1435_v34 = vcombine.high %v1434_v6, %v1434_v6  ;;  %v1073_v39 = vrot.slane %v1066_v16, %v7598_v1  ;;  %v1143_v9 = vshll.u32 %v1141_v21, 16  ;;  %v1289_v14 = vshll.u32 %v1287_v27, 16  ;;  %v1219_v44 = vld [vmem:[#allocation3 + $0x21] sm:$0x7]  ;;  %v1292_v31 = vld [vmem:[#allocation3 + $0x24] sm:$0x7] }
 0x2f5   :  { %5103 = vmatprep.mubr.bf16.mxu0 %v2353_v63  ;;  %6414 = vmatprep.subr.bf16.mxu0 %v6976_v60  ;;  %v1003_v41 = vsel %vm7711_vm3, %v999_v36, %v1002_v38  ;;  %v1217_v43 = vrot.slane %v1210_v28, %v7598_v1  ;;  %v1365_v37 = vcombine.high %v1364_v29, %v1364_v29  ;;  %v1367_v46 = vld [vmem:[#allocation3 + $0x27] sm:$0x7]  ;;  %v6988_v17 = vld [vmem:[%s8983_s4 + $0x1e0] sm:$0xff]   ;;  %v1440_v25 = vld [vmem:[#allocation3 + $0x2a] sm:$0x7] }
 0x2f6   :  { %6393 = vmatpush3.bf16.msra.mxu1 %v6975_v0  ;;  %v1076_v42 = vsel %vm7711_vm3, %v1073_v39, %v1075_v8  ;;  %1004 = vst [vmem:[#allocation3 + $0x18] sm:$0x7] %v1003_v41  ;;  %v1147_v11 = vsel %vm7711_vm3, %v1143_v9, %v1146_v23  ;;  %v1437_v13 = vshll.u32 %v1435_v34, 16  ;;  %v1513_v47 = vcombine.high %v1512_v32, %v1512_v32  ;;  %v1515_v50 = vld [vmem:[#allocation3 + $0x2d] sm:$0x7]  ;;  %v6987_v26 = vld [vmem:[%s8983_s4 + $0x120] sm:$0xff]  }
 0x2f7   :  { %6394 = vmatprep.subr.bf16.mxu1 %v6978_v5  ;;  %1077 = vst [vmem:[#allocation3 + $0x1b] sm:$0x7] %v1076_v42  ;;  %1148 = vst [vmem:[#allocation3 + $0x1e] sm:$0x7] %v1147_v11  ;;  %v1220_v48 = vsel %vm7711_vm3, %v1217_v43, %v1219_v44  ;;  %v1293_v18 = vsel %vm7711_vm3, %v1289_v14, %v1292_v31  ;;  %v1368_v49 = vsel %vm7711_vm3, %v1365_v37, %v1367_v46  ;;  %v6990_v53 = vld [vmem:[%s8983_s4 + $0x168] sm:$0xff]   ;;  %v6989_v54 = vld [vmem:[%s8983_s4 + $0x1a0] sm:$0xff]  }
 0x2f8   :  { %6415 = vmatpush3.bf16.msra.mxu0 %v6977_v10  ;;  %1221 = vst [vmem:[#allocation3 + $0x21] sm:$0x7] %v1220_v48  ;;  %1294 = vst [vmem:[#allocation3 + $0x24] sm:$0x7] %v1293_v18  ;;  %v1441_v51 = vsel %vm7711_vm3, %v1437_v13, %v1440_v25  ;;  %v1516_v52 = vsel %vm7711_vm3, %v1513_v47, %v1515_v50  ;;  %v6992_v55 = vld [vmem:[%s8983_s4 + $0x1e8] sm:$0xff]   ;;  %v6994_v56 = vld [vmem:[%s8983_s4 + $0x170] sm:$0xff]   ;;  %v2335_v6 = vrot.slane %v7749_v22, %v7598_v1 }
 0x2f9   :  { %6416 = vmatprep.subr.bf16.mxu0 %v6980_v19  ;;  %1369 = vst [vmem:[#allocation3 + $0x27] sm:$0x7] %v1368_v49  ;;  %1442 = vst [vmem:[#allocation3 + $0x2a] sm:$0x7] %v1441_v51  ;;  %v7861_v57 = vld [vmem:[#allocation3 + $0x8] sm:$0xff]  ;;  %v6993_v58 = vld [vmem:[%s8983_s4 + $0x1a8] sm:$0xff]  }
 0x2fa   :  { %6395 = vmatpush3.bf16.msra.mxu1 %v6979_v24  ;;  %1517 = vst [vmem:[#allocation3 + $0x2d] sm:$0x7] %v1516_v52  ;;  %v6996_v59 = vld [vmem:[%s8983_s4 + $0x1f0] sm:$0xff]   ;;  %v7874_v61 = vrot.slane %v7861_v57, %v7598_v1  ;;  %v6998_v62 = vld [vmem:[%s8983_s4 + $0x178] sm:$0xff]   ;;  %v7002_v4 = vld [vmem:[%s8983_s4 + $0x240] sm:$0xff]   ;;  %v2351_v19 = vcombine.high %v2335_v6, %v2335_v6  ;;  %v2354_v42 = vcombine.high %v7861_v57, %v7861_v57 }
 0x2fb   :  { %6396 = vmatprep.subr.bf16.mxu1 %v6982_v30  ;;  %v6995_v60 = vld [vmem:[%s8983_s4 + $0x130] sm:$0xff]   ;;  %v7000_v0 = vld [vmem:[%s8983_s4 + $0x1f8] sm:$0xff]   ;;  %v7004_v7 = vld [vmem:[%s8983_s4 + $0x2c0] sm:$0xff]  }
 0x2fc   :  { %6417 = vmatpush3.bf16.msra.mxu0 %v6981_v33  ;;  %v6997_v63 = vld [vmem:[%s8983_s4 + $0x1b0] sm:$0xff]   ;;  %v6999_v2 = vld [vmem:[%s8983_s4 + $0x138] sm:$0xff]   ;;  %v2369_v3 = vcombine.high %v7874_v61, %v7874_v61  ;;  %v7003_v10 = vld [vmem:[%s8983_s4 + $0x200] sm:$0xff]   ;;  %v7980_v37 = vrot.slane %v2354_v42, %v7598_v1  ;;  %v2377_v18 = vrot.slane %v7874_v61, %v7598_v1 }
 0x2fd   :  { %6418 = vmatprep.subr.bf16.mxu0 %v6984_v35  ;;  %v7001_v5 = vld [vmem:[%s8983_s4 + $0x1b8] sm:$0xff]   ;;  %v7006_v16 = vld [vmem:[%s8983_s4 + $0x248] sm:$0xff]   ;;  %v7005_v22 = vld [vmem:[%s8983_s4 + $0x280] sm:$0xff]  }
 0x2fe   :  { %6397 = vmatpush3.bf16.msra.mxu1 %v6983_v20  ;;  %v2391_v15 = vrot.slane %v2369_v3, %v7598_v1  ;;  %v7008_v21 = vld [vmem:[%s8983_s4 + $0x2c8] sm:$0xff]   ;;  %v7010_v28 = vld [vmem:[%s8983_s4 + $0x250] sm:$0xff]   ;;  %v7014_v33 = vld [vmem:[%s8983_s4 + $0x258] sm:$0xff]   ;;  %v2370_v47 = vcombine.high %v7980_v37, %v7980_v37  ;;  %v2399_v52 = vcombine.high %v2377_v18, %v2377_v18 }
 0x2ff   :  { %6398 = vmatprep.subr.bf16.mxu1 %v6986_v40  ;;  %v7007_v27 = vld [vmem:[%s8983_s4 + $0x208] sm:$0xff]   ;;  %v7012_v30 = vld [vmem:[%s8983_s4 + $0x2d0] sm:$0xff]   ;;  %v7016_v35 = vld [vmem:[%s8983_s4 + $0x2d8] sm:$0xff]  }
 0x300   :  { %6419 = vmatpush3.bf16.msra.mxu0 %v6985_v45  ;;  %v2401_v24 = vcombine.high %v2391_v15, %v2391_v15  ;;  %v7009_v29 = vld [vmem:[%s8983_s4 + $0x288] sm:$0xff]   ;;  %v7011_v32 = vld [vmem:[%s8983_s4 + $0x210] sm:$0xff]   ;;  %v7015_v36 = vld [vmem:[%s8983_s4 + $0x218] sm:$0xff]   ;;  %v2398_v50 = vrot.slane %v2370_v47, %v7598_v1 }
 0x301   :  { %6420 = vmatprep.subr.bf16.mxu0 %v6988_v17  ;;  %v7013_v34 = vld [vmem:[%s8983_s4 + $0x290] sm:$0xff]   ;;  %v7018_v38 = vld [vmem:[%s8983_s4 + $0x260] sm:$0xff]   ;;  %v7017_v39 = vld [vmem:[%s8983_s4 + $0x298] sm:$0xff]  }
 0x302   :  { %6399 = vmatpush3.bf16.msra.mxu1 %v6987_v26  ;;  %v7020_v20 = vld [vmem:[%s8983_s4 + $0x2e0] sm:$0xff]   ;;  %v7022_v8 = vld [vmem:[%s8983_s4 + $0x268] sm:$0xff]   ;;  %v7026_v23 = vld [vmem:[%s8983_s4 + $0x270] sm:$0xff]  }
 0x303   :  { %6400 = vmatprep.subr.bf16.mxu1 %v6990_v53  ;;  %v7019_v40 = vld [vmem:[%s8983_s4 + $0x220] sm:$0xff]   ;;  %v7024_v14 = vld [vmem:[%s8983_s4 + $0x2e8] sm:$0xff]   ;;  %v7028_v44 = vld [vmem:[%s8983_s4 + $0x2f0] sm:$0xff]  }
 0x304   :  { %6421 = vmatpush3.bf16.msra.mxu0 %v6989_v54  ;;  %v7021_v9 = vld [vmem:[%s8983_s4 + $0x2a0] sm:$0xff]   ;;  %v7023_v41 = vld [vmem:[%s8983_s4 + $0x228] sm:$0xff]   ;;  %v7027_v31 = vld [vmem:[%s8983_s4 + $0x230] sm:$0xff]   ;;  %v2402_v54 = vcombine.high %v2398_v50, %v2398_v50 }
 0x305   :  { %6422 = vmatprep.subr.bf16.mxu0 %v6992_v55  ;;  %v7025_v43 = vld [vmem:[%s8983_s4 + $0x2a8] sm:$0xff]   ;;  %v7030_v45 = vld [vmem:[%s8983_s4 + $0x278] sm:$0xff]   ;;  %v7029_v11 = vld [vmem:[%s8983_s4 + $0x2b0] sm:$0xff]  }
 0x306   :  { %6401 = vmatpush3.bf16.msra.mxu1 %v6991_v12  ;;  %v7032_v46 = vld [vmem:[%s8983_s4 + $0x2f8] sm:$0xff]   ;;  %v7034_v17 = vld [vmem:[%s8983_s4 + $0x340] sm:$0xff]   ;;  %v7039_v26 = vld [vmem:[%s8983_s4 + $0x348] sm:$0xff]  }
 0x307   :  { %6402 = vmatprep.subr.bf16.mxu1 %v6994_v56  ;;  %v7031_v13 = vld [vmem:[%s8983_s4 + $0x238] sm:$0xff]   ;;  %v7037_v49 = vld [vmem:[%s8983_s4 + $0x3c0] sm:$0xff]   ;;  %v7041_v53 = vld [vmem:[%s8983_s4 + $0x3c8] sm:$0xff]  }
 0x308   :  { %6423 = vmatpush3.bf16.msra.mxu0 %v6993_v58  ;;  %v7033_v48 = vld [vmem:[%s8983_s4 + $0x2b8] sm:$0xff]   ;;  %v7035_v25 = vld [vmem:[%s8983_s4 + $0x300] sm:$0xff]   ;;  %v7040_v55 = vld [vmem:[%s8983_s4 + $0x308] sm:$0xff]  }
 0x309   :  { %6424 = vmatprep.subr.bf16.mxu0 %v6996_v59  ;;  %v7038_v51 = vld [vmem:[%s8983_s4 + $0x380] sm:$0xff]   ;;  %v7043_v12 = vld [vmem:[%s8983_s4 + $0x350] sm:$0xff]   ;;  %v7042_v56 = vld [vmem:[%s8983_s4 + $0x388] sm:$0xff]  }
 0x30a   :  { %6403 = vmatpush3.bf16.msra.mxu1 %v6995_v60  ;;  %v7045_v57 = vld [vmem:[%s8983_s4 + $0x3d0] sm:$0xff]   ;;  %v7047_v59 = vld [vmem:[%s8983_s4 + $0x358] sm:$0xff]   ;;  %v7052_v3 = vld [vmem:[%s8983_s4 + $0x320] sm:$0xff]  }
 0x30b   :  { %6404 = vmatprep.subr.bf16.mxu1 %v6998_v62  ;;  %v7044_v58 = vld [vmem:[%s8983_s4 + $0x310] sm:$0xff]   ;;  %v7049_v61 = vld [vmem:[%s8983_s4 + $0x3d8] sm:$0xff]   ;;  %v7074_v42 = vld [vmem:[%s8983_s4 + $0x488] sm:$0xff]  }
 0x30c   :  { %6425 = vmatpush3.bf16.msra.mxu0 %v6997_v63  ;;  %v7046_v60 = vld [vmem:[%s8983_s4 + $0x390] sm:$0xff]   ;;  %v7048_v62 = vld [vmem:[%s8983_s4 + $0x318] sm:$0xff]   ;;  %v7051_v63 = vld [vmem:[%s8983_s4 + $0x360] sm:$0xff]  }
 0x30d   :  { %6426 = vmatprep.subr.bf16.mxu0 %v7000_v0  ;;  %v7050_v0 = vld [vmem:[%s8983_s4 + $0x398] sm:$0xff]   ;;  %v7084_v47 = vld [vmem:[%s8983_s4 + $0x420] sm:$0xff]  }
 0x30e   :  { %6405 = vmatpush3.bf16.msra.mxu1 %v6999_v2  ;;  %v7053_v2 = vld [vmem:[%s8983_s4 + $0x3e0] sm:$0xff]  }
 0x30f   :  { %6434 = vmatprep.subr.bf16.mxu1 %v7002_v4  ;;  %v7055_v4 = vld [vmem:[%s8983_s4 + $0x368] sm:$0xff]  }
 0x310   :  { %6427 = vmatpush3.bf16.msra.mxu0 %v7001_v5  ;;  %v7054_v5 = vld [vmem:[%s8983_s4 + $0x3a0] sm:$0xff]  }
 0x311   :  { %5064 = vmatmul.mubr.bf16.vlgmr.msra.gmra.mrb[8].mxu1 %v2335_v6  ;;  %6456 = vmatprep.subr.bf16.mxu0 %v7004_v7  ;;  %v7057_v6 = vld [vmem:[%s8983_s4 + $0x3e8] sm:$0xff]  }
 0x312   :  { %6435 = vmatpush3.bf16.msra.mxu1 %v7003_v10  ;;  %5143 = vmatprep.mubr.bf16.mxu1 %v2391_v15  ;;  %v7056_v7 = vld [vmem:[%s8983_s4 + $0x328] sm:$0xff]   ;;  %v7059_v10 = vld [vmem:[%s8983_s4 + $0x370] sm:$0xff]   ;;  %v8074_v15 = vld [vmem:[#allocation3 + $0x10] sm:$0xff] }
 0x313   :  { %5104 = vmatmul.mubr.bf16.vlgmr.msra.gmra.mrb[12].mxu0 %v2351_v19  ;;  %6436 = vmatprep.subr.bf16.mxu1 %v7006_v16  ;;  %v7058_v16 = vld [vmem:[%s8983_s4 + $0x3a8] sm:$0xff]   ;;  %v7060_v19 = vld [vmem:[%s8983_s4 + $0x330] sm:$0xff]  }
 0x314   :  { %6457 = vmatpush3.bf16.msra.mxu0 %v7005_v22  ;;  %5183 = vmatprep.mubr.bf16.mxu0 %v2401_v24  ;;  %v7061_v22 = vld [vmem:[%s8983_s4 + $0x3f0] sm:$0xff]   ;;  %v7063_v24 = vld [vmem:[%s8983_s4 + $0x378] sm:$0xff]  }
 0x315   :  { %6458 = vmatprep.subr.bf16.mxu0 %v7008_v21  ;;  %v8087_v21 = vrot.slane %v8074_v15, %v7598_v1 }
 0x316   :  { %6437 = vmatpush3.bf16.msra.mxu1 %v7007_v27  ;;  %v7062_v27 = vld [vmem:[%s8983_s4 + $0x3b0] sm:$0xff]  }
 0x317   :  { %6438 = vmatprep.subr.bf16.mxu1 %v7010_v28  ;;  %v7065_v28 = vld [vmem:[%s8983_s4 + $0x3f8] sm:$0xff]  }
 0x318   :  { %6459 = vmatpush3.bf16.msra.mxu0 %v7009_v29  ;;  %v7064_v29 = vld [vmem:[%s8983_s4 + $0x338] sm:$0xff]  }
 0x319   :  { %6460 = vmatprep.subr.bf16.mxu0 %v7012_v30  ;;  %v2418_v30 = vcombine.high %v8087_v21, %v8087_v21 }
 0x31a   :  { %6439 = vmatpush3.bf16.msra.mxu1 %v7011_v32  ;;  %v7067_v32 = vld [vmem:[%s8983_s4 + $0x440] sm:$0xff]  }
 0x31b   :  { %6440 = vmatprep.subr.bf16.mxu1 %v7014_v33  ;;  %v7066_v33 = vld [vmem:[%s8983_s4 + $0x3b8] sm:$0xff]  }
 0x31c   :  { %6461 = vmatpush3.bf16.msra.mxu0 %v7013_v34  ;;  %v2384_v34 = vrot.slane %v7980_v37, %v7598_v1  ;;  %v7081_v37 = vld [vmem:[%s8983_s4 + $0x4d8] sm:$0xff]  }
 0x31d   :  { %6462 = vmatprep.subr.bf16.mxu0 %v7016_v35  ;;  %v7069_v35 = vld [vmem:[%s8983_s4 + $0x4c0] sm:$0xff]  }
 0x31e   :  { %6441 = vmatpush3.bf16.msra.mxu1 %v7015_v36  ;;  %v7068_v36 = vld [vmem:[%s8983_s4 + $0x400] sm:$0xff]  }
 0x31f   :  { %6442 = vmatprep.subr.bf16.mxu1 %v7018_v38  ;;  %v2440_v38 = vrot.slane %v2418_v30, %v7598_v1  ;;  %v7117_v30 = vld [vmem:[%s8983_s4 + $0x520] sm:$0xff]  }
 0x320   :  { %6463 = vmatpush3.bf16.msra.mxu0 %v7017_v39  ;;  %v7071_v39 = vld [vmem:[%s8983_s4 + $0x448] sm:$0xff]  }
 0x321   :  { %6464 = vmatprep.subr.bf16.mxu0 %v7020_v20  ;;  %v7070_v20 = vld [vmem:[%s8983_s4 + $0x480] sm:$0xff]  }
 0x322   :  { %6443 = vmatpush3.bf16.msra.mxu1 %v7019_v40  ;;  %v2400_v40 = vcombine.high %v2384_v34, %v2384_v34 }
 0x323   :  { %6444 = vmatprep.subr.bf16.mxu1 %v7022_v8  ;;  %v7073_v8 = vld [vmem:[%s8983_s4 + $0x4c8] sm:$0xff]  }
 0x324   :  { %6465 = vmatpush3.bf16.msra.mxu0 %v7021_v9  ;;  %v2450_v9 = vcombine.high %v2440_v38, %v2440_v38 }
 0x325   :  { %6466 = vmatprep.subr.bf16.mxu0 %v7024_v14  ;;  %v7072_v14 = vld [vmem:[%s8983_s4 + $0x408] sm:$0xff]  }
 0x326   :  { %6445 = vmatpush3.bf16.msra.mxu1 %v7023_v41  ;;  %v7075_v41 = vld [vmem:[%s8983_s4 + $0x450] sm:$0xff]  }
 0x327   :  { %6446 = vmatprep.subr.bf16.mxu1 %v7026_v23  ;;  %v7077_v23 = vld [vmem:[%s8983_s4 + $0x4d0] sm:$0xff]  }
 0x328   :  { %6467 = vmatpush3.bf16.msra.mxu0 %v7025_v43  ;;  %v7076_v43 = vld [vmem:[%s8983_s4 + $0x410] sm:$0xff]  }
 0x329   :  { %6468 = vmatprep.subr.bf16.mxu0 %v7028_v44  ;;  %v7079_v44 = vld [vmem:[%s8983_s4 + $0x458] sm:$0xff]  }
 0x32a   :  { %6447 = vmatpush3.bf16.msra.mxu1 %v7027_v31  ;;  %v7078_v31 = vld [vmem:[%s8983_s4 + $0x490] sm:$0xff]  }
 0x32b   :  { %6448 = vmatprep.subr.bf16.mxu1 %v7030_v45  ;;  %v7080_v45 = vld [vmem:[%s8983_s4 + $0x418] sm:$0xff]  }
 0x32c   :  { %6469 = vmatpush3.bf16.msra.mxu0 %v7029_v11  ;;  %v7083_v11 = vld [vmem:[%s8983_s4 + $0x460] sm:$0xff]  }
 0x32d   :  { %6470 = vmatprep.subr.bf16.mxu0 %v7032_v46  ;;  %v7082_v46 = vld [vmem:[%s8983_s4 + $0x498] sm:$0xff]  }
 0x32e   :  { %6449 = vmatpush3.bf16.msra.mxu1 %v7031_v13  ;;  %v7085_v13 = vld [vmem:[%s8983_s4 + $0x4e0] sm:$0xff]  }
 0x32f   :  { %6478 = vmatprep.subr.bf16.mxu1 %v7034_v17  ;;  %v7087_v17 = vld [vmem:[%s8983_s4 + $0x468] sm:$0xff]  }
 0x330   :  { %6471 = vmatpush3.bf16.msra.mxu0 %v7033_v48  ;;  %v7086_v48 = vld [vmem:[%s8983_s4 + $0x4a0] sm:$0xff]  }
 0x331   :  { %5144 = vmatmul.mubr.bf16.vlgmr.msra.gmra.mrb[12].mxu1 %v2377_v18  ;;  %6500 = vmatprep.subr.bf16.mxu0 %v7037_v49  ;;  %v7089_v18 = vld [vmem:[%s8983_s4 + $0x4e8] sm:$0xff]  }
 0x332   :  { %6479 = vmatpush3.bf16.msra.mxu1 %v7035_v25  ;;  %5223 = vmatprep.mubr.bf16.mxu1 %v2398_v50  ;;  %v7088_v49 = vld [vmem:[%s8983_s4 + $0x428] sm:$0xff]   ;;  %v2403_v25 = vcombine.high %v8074_v15, %v8074_v15  ;;  %v7091_v50 = vld [vmem:[%s8983_s4 + $0x470] sm:$0xff]  }
 0x333   :  { %5184 = vmatmul.mubr.bf16.vlgmr.msra.gmra.mrb[16].mxu0 %v2399_v52  ;;  %6480 = vmatprep.subr.bf16.mxu1 %v7039_v26  ;;  %v7090_v26 = vld [vmem:[%s8983_s4 + $0x4a8] sm:$0xff]   ;;  %v7092_v52 = vld [vmem:[%s8983_s4 + $0x430] sm:$0xff]  }
 0x334   :  { %6501 = vmatpush3.bf16.msra.mxu0 %v7038_v51  ;;  %5263 = vmatprep.mubr.bf16.mxu0 %v2402_v54  ;;  %v7093_v51 = vld [vmem:[%s8983_s4 + $0x4f0] sm:$0xff]   ;;  %v7095_v54 = vld [vmem:[%s8983_s4 + $0x478] sm:$0xff]  }
 0x335   :  { %6502 = vmatprep.subr.bf16.mxu0 %v7041_v53  ;;  %v8193_v53 = vrot.slane %v2403_v25, %v7598_v1  ;;  %v7110_v15 = vld [vmem:[%s8983_s4 + $0x5d0] sm:$0xff]   ;;  %v7139_v25 = vld [vmem:[%s8983_s4 + $0x688] sm:$0xff]  }
 0x336   :  { %6481 = vmatpush3.bf16.msra.mxu1 %v7040_v55  ;;  %v7094_v55 = vld [vmem:[%s8983_s4 + $0x4b0] sm:$0xff]  }
 0x337   :  { %6482 = vmatprep.subr.bf16.mxu1 %v7043_v12  ;;  %v7097_v12 = vld [vmem:[%s8983_s4 + $0x4f8] sm:$0xff]  }
 0x338   :  { %6503 = vmatpush3.bf16.msra.mxu0 %v7042_v56  ;;  %v7096_v56 = vld [vmem:[%s8983_s4 + $0x438] sm:$0xff]  }
 0x339   :  { %6504 = vmatprep.subr.bf16.mxu0 %v7045_v57  ;;  %v2419_v57 = vcombine.high %v8193_v53, %v8193_v53 }
 0x33a   :  { %6483 = vmatpush3.bf16.msra.mxu1 %v7044_v58  ;;  %v7099_v58 = vld [vmem:[%s8983_s4 + $0x540] sm:$0xff]  }
 0x33b   :  { %6484 = vmatprep.subr.bf16.mxu1 %v7047_v59  ;;  %v7098_v59 = vld [vmem:[%s8983_s4 + $0x4b8] sm:$0xff]  }
 0x33c   :  { %6505 = vmatpush3.bf16.msra.mxu0 %v7046_v60  ;;  %v2426_v60 = vrot.slane %v8087_v21, %v7598_v1  ;;  %v7114_v21 = vld [vmem:[%s8983_s4 + $0x5d8] sm:$0xff]  }
 0x33d   :  { %6506 = vmatprep.subr.bf16.mxu0 %v7049_v61  ;;  %v7102_v61 = vld [vmem:[%s8983_s4 + $0x5c0] sm:$0xff]  }
 0x33e   :  { %6485 = vmatpush3.bf16.msra.mxu1 %v7048_v62  ;;  %v7100_v62 = vld [vmem:[%s8983_s4 + $0x500] sm:$0xff]  }
 0x33f   :  { %6486 = vmatprep.subr.bf16.mxu1 %v7051_v63  ;;  %v2447_v63 = vrot.slane %v2419_v57, %v7598_v1  ;;  %v7149_v57 = vld [vmem:[%s8983_s4 + $0x620] sm:$0xff]  }
 0x340   :  { %6507 = vmatpush3.bf16.msra.mxu0 %v7050_v0  ;;  %v7104_v0 = vld [vmem:[%s8983_s4 + $0x548] sm:$0xff]  }
 0x341   :  { %6508 = vmatprep.subr.bf16.mxu0 %v7053_v2  ;;  %v7103_v2 = vld [vmem:[%s8983_s4 + $0x580] sm:$0xff]  }
 0x342   :  { %6487 = vmatpush3.bf16.msra.mxu1 %v7052_v3  ;;  %v2448_v3 = vcombine.high %v2426_v60, %v2426_v60 }
 0x343   :  { %6488 = vmatprep.subr.bf16.mxu1 %v7055_v4  ;;  %v7106_v4 = vld [vmem:[%s8983_s4 + $0x5c8] sm:$0xff]  }
 0x344   :  { %6509 = vmatpush3.bf16.msra.mxu0 %v7054_v5  ;;  %v2451_v5 = vcombine.high %v2447_v63, %v2447_v63 }
 0x345   :  { %6510 = vmatprep.subr.bf16.mxu0 %v7057_v6  ;;  %v7105_v6 = vld [vmem:[%s8983_s4 + $0x508] sm:$0xff]  }
 0x346   :  { %6489 = vmatpush3.bf16.msra.mxu1 %v7056_v7  ;;  %v7108_v7 = vld [vmem:[%s8983_s4 + $0x550] sm:$0xff]  }
 0x347   :  { %6490 = vmatprep.subr.bf16.mxu1 %v7059_v10  ;;  %v7107_v10 = vld [vmem:[%s8983_s4 + $0x588] sm:$0xff]  }
 0x348   :  { %6511 = vmatpush3.bf16.msra.mxu0 %v7058_v16  ;;  %v7109_v16 = vld [vmem:[%s8983_s4 + $0x510] sm:$0xff]  }
 0x349   :  { %6512 = vmatprep.subr.bf16.mxu0 %v7061_v22  ;;  %v7112_v22 = vld [vmem:[%s8983_s4 + $0x558] sm:$0xff]  }
 0x34a   :  { %6491 = vmatpush3.bf16.msra.mxu1 %v7060_v19  ;;  %v7111_v19 = vld [vmem:[%s8983_s4 + $0x590] sm:$0xff]  }
 0x34b   :  { %6492 = vmatprep.subr.bf16.mxu1 %v7063_v24  ;;  %v7113_v24 = vld [vmem:[%s8983_s4 + $0x518] sm:$0xff]  }
 0x34c   :  { %6513 = vmatpush3.bf16.msra.mxu0 %v7062_v27  ;;  %v7116_v27 = vld [vmem:[%s8983_s4 + $0x560] sm:$0xff]  }
 0x34d   :  { %6514 = vmatprep.subr.bf16.mxu0 %v7065_v28  ;;  %v7115_v28 = vld [vmem:[%s8983_s4 + $0x598] sm:$0xff]  }
 0x34e   :  { %6493 = vmatpush3.bf16.msra.mxu1 %v7064_v29  ;;  %v7118_v29 = vld [vmem:[%s8983_s4 + $0x5e0] sm:$0xff]  }
 0x34f   :  { %6522 = vmatprep.subr.bf16.mxu1 %v7067_v32  ;;  %v7120_v32 = vld [vmem:[%s8983_s4 + $0x568] sm:$0xff]  }
 0x350   :  { %6515 = vmatpush3.bf16.msra.mxu0 %v7066_v33  ;;  %v7119_v33 = vld [vmem:[%s8983_s4 + $0x5a0] sm:$0xff]  }
 0x351   :  { %5224 = vmatmul.mubr.bf16.vlgmr.msra.gmra.mrb[16].mxu1 %v2384_v34  ;;  %6544 = vmatprep.subr.bf16.mxu0 %v7069_v35  ;;  %v7122_v34 = vld [vmem:[%s8983_s4 + $0x5e8] sm:$0xff]  }
 0x352   :  { %6523 = vmatpush3.bf16.msra.mxu1 %v7068_v36  ;;  %5303 = vmatprep.mubr.bf16.mxu1 %v2440_v38  ;;  %v7121_v35 = vld [vmem:[%s8983_s4 + $0x528] sm:$0xff]   ;;  %v7124_v36 = vld [vmem:[%s8983_s4 + $0x570] sm:$0xff]  }
 0x353   :  { %5264 = vmatmul.mubr.bf16.vlgmr.msra.gmra.mrb[20].mxu0 %v2400_v40  ;;  %6524 = vmatprep.subr.bf16.mxu1 %v7071_v39  ;;  %v8287_v38 = vld [vmem:[#allocation3 + $0x18] sm:$0xff]  ;;  %v7125_v40 = vld [vmem:[%s8983_s4 + $0x530] sm:$0xff]  }
 0x354   :  { %6545 = vmatpush3.bf16.msra.mxu0 %v7070_v20  ;;  %5343 = vmatprep.mubr.bf16.mxu0 %v2450_v9  ;;  %v7123_v39 = vld [vmem:[%s8983_s4 + $0x5a8] sm:$0xff]   ;;  %v7126_v20 = vld [vmem:[%s8983_s4 + $0x5f0] sm:$0xff]   ;;  %v7128_v9 = vld [vmem:[%s8983_s4 + $0x578] sm:$0xff]  }
 0x355   :  { %6546 = vmatprep.subr.bf16.mxu0 %v7073_v8  ;;  %v8300_v8 = vrot.slane %v8287_v38, %v7598_v1 }
 0x356   :  { %6525 = vmatpush3.bf16.msra.mxu1 %v7072_v14  ;;  %v7127_v14 = vld [vmem:[%s8983_s4 + $0x5b0] sm:$0xff]  }
 0x357   :  { %6526 = vmatprep.subr.bf16.mxu1 %v7075_v41  ;;  %v7130_v41 = vld [vmem:[%s8983_s4 + $0x5f8] sm:$0xff]  }
 0x358   :  { %6547 = vmatpush3.bf16.msra.mxu0 %v7074_v42  ;;  %v7129_v42 = vld [vmem:[%s8983_s4 + $0x538] sm:$0xff]  }
 0x359   :  { %6548 = vmatprep.subr.bf16.mxu0 %v7077_v23  ;;  %v2467_v23 = vcombine.high %v8300_v8, %v8300_v8 }
 0x35a   :  { %6527 = vmatpush3.bf16.msra.mxu1 %v7076_v43  ;;  %v7132_v43 = vld [vmem:[%s8983_s4 + $0x640] sm:$0xff]  }
 0x35b   :  { %6528 = vmatprep.subr.bf16.mxu1 %v7079_v44  ;;  %v7131_v44 = vld [vmem:[%s8983_s4 + $0x5b8] sm:$0xff]  }
 0x35c   :  { %6549 = vmatpush3.bf16.msra.mxu0 %v7078_v31  ;;  %v2433_v31 = vrot.slane %v8193_v53, %v7598_v1  ;;  %v7146_v53 = vld [vmem:[%s8983_s4 + $0x6d8] sm:$0xff]  }
 0x35d   :  { %6550 = vmatprep.subr.bf16.mxu0 %v7081_v37  ;;  %v7134_v37 = vld [vmem:[%s8983_s4 + $0x6c0] sm:$0xff]  }
 0x35e   :  { %6529 = vmatpush3.bf16.msra.mxu1 %v7080_v45  ;;  %v7133_v45 = vld [vmem:[%s8983_s4 + $0x600] sm:$0xff]  }
 0x35f   :  { %6530 = vmatprep.subr.bf16.mxu1 %v7083_v11  ;;  %v2489_v11 = vrot.slane %v2467_v23, %v7598_v1  ;;  %v7182_v23 = vld [vmem:[%s8983_s4 + $0x720] sm:$0xff]  }
 0x360   :  { %6551 = vmatpush3.bf16.msra.mxu0 %v7082_v46  ;;  %v7136_v46 = vld [vmem:[%s8983_s4 + $0x648] sm:$0xff]  }
 0x361   :  { %6552 = vmatprep.subr.bf16.mxu0 %v7085_v13  ;;  %v7135_v13 = vld [vmem:[%s8983_s4 + $0x680] sm:$0xff]  }
 0x362   :  { %6531 = vmatpush3.bf16.msra.mxu1 %v7084_v47  ;;  %v2449_v47 = vcombine.high %v2433_v31, %v2433_v31 }
 0x363   :  { %6532 = vmatprep.subr.bf16.mxu1 %v7087_v17  ;;  %v7138_v17 = vld [vmem:[%s8983_s4 + $0x6c8] sm:$0xff]  }
 0x364   :  { %6553 = vmatpush3.bf16.msra.mxu0 %v7086_v48  ;;  %v2499_v48 = vcombine.high %v2489_v11, %v2489_v11 }
 0x365   :  { %6554 = vmatprep.subr.bf16.mxu0 %v7089_v18  ;;  %v7137_v18 = vld [vmem:[%s8983_s4 + $0x608] sm:$0xff]  }
 0x366   :  { %6533 = vmatpush3.bf16.msra.mxu1 %v7088_v49  ;;  %v7140_v49 = vld [vmem:[%s8983_s4 + $0x650] sm:$0xff]  }
 0x367   :  { %6534 = vmatprep.subr.bf16.mxu1 %v7091_v50  ;;  %v7142_v50 = vld [vmem:[%s8983_s4 + $0x6d0] sm:$0xff]  }
 0x368   :  { %6555 = vmatpush3.bf16.msra.mxu0 %v7090_v26  ;;  %v7141_v26 = vld [vmem:[%s8983_s4 + $0x610] sm:$0xff]  }
 0x369   :  { %6556 = vmatprep.subr.bf16.mxu0 %v7093_v51  ;;  %v7144_v51 = vld [vmem:[%s8983_s4 + $0x658] sm:$0xff]  }
 0x36a   :  { %6535 = vmatpush3.bf16.msra.mxu1 %v7092_v52  ;;  %v7143_v52 = vld [vmem:[%s8983_s4 + $0x690] sm:$0xff]  }
 0x36b   :  { %6536 = vmatprep.subr.bf16.mxu1 %v7095_v54  ;;  %v7145_v54 = vld [vmem:[%s8983_s4 + $0x618] sm:$0xff]  }
 0x36c   :  { %6557 = vmatpush3.bf16.msra.mxu0 %v7094_v55  ;;  %v7148_v55 = vld [vmem:[%s8983_s4 + $0x660] sm:$0xff]  }
 0x36d   :  { %6558 = vmatprep.subr.bf16.mxu0 %v7097_v12  ;;  %v7147_v12 = vld [vmem:[%s8983_s4 + $0x698] sm:$0xff]  }
 0x36e   :  { %6537 = vmatpush3.bf16.msra.mxu1 %v7096_v56  ;;  %v7150_v56 = vld [vmem:[%s8983_s4 + $0x6e0] sm:$0xff]  }
 0x36f   :  { %6566 = vmatprep.subr.bf16.mxu1 %v7099_v58  ;;  %v7152_v58 = vld [vmem:[%s8983_s4 + $0x668] sm:$0xff]  }
 0x370   :  { %6559 = vmatpush3.bf16.msra.mxu0 %v7098_v59  ;;  %v7151_v59 = vld [vmem:[%s8983_s4 + $0x6a0] sm:$0xff]  }
 0x371   :  { %5304 = vmatmul.mubr.bf16.vlgmr.msra.gmra.mrb[20].mxu1 %v2426_v60  ;;  %6588 = vmatprep.subr.bf16.mxu0 %v7102_v61  ;;  %v7154_v60 = vld [vmem:[%s8983_s4 + $0x6e8] sm:$0xff]  }
 0x372   :  { %6567 = vmatpush3.bf16.msra.mxu1 %v7100_v62  ;;  %5383 = vmatprep.mubr.bf16.mxu1 %v2447_v63  ;;  %v7153_v61 = vld [vmem:[%s8983_s4 + $0x628] sm:$0xff]   ;;  %v2452_v62 = vcombine.high %v8287_v38, %v8287_v38  ;;  %v7156_v63 = vld [vmem:[%s8983_s4 + $0x670] sm:$0xff]  }
 0x373   :  { %5344 = vmatmul.mubr.bf16.vlgmr.msra.gmra.mrb[24].mxu0 %v2448_v3  ;;  %6568 = vmatprep.subr.bf16.mxu1 %v7104_v0  ;;  %v7155_v0 = vld [vmem:[%s8983_s4 + $0x6a8] sm:$0xff]   ;;  %v7157_v3 = vld [vmem:[%s8983_s4 + $0x630] sm:$0xff]  }
 0x374   :  { %6589 = vmatpush3.bf16.msra.mxu0 %v7103_v2  ;;  %5423 = vmatprep.mubr.bf16.mxu0 %v2451_v5  ;;  %v7158_v2 = vld [vmem:[%s8983_s4 + $0x6f0] sm:$0xff]   ;;  %v7160_v5 = vld [vmem:[%s8983_s4 + $0x678] sm:$0xff]  }
 0x375   :  { %6590 = vmatprep.subr.bf16.mxu0 %v7106_v4  ;;  %v8406_v4 = vrot.slane %v2452_v62, %v7598_v1  ;;  %v7175_v38 = vld [vmem:[%s8983_s4 + $0x7d0] sm:$0xff]   ;;  %v7197_v62 = vld [vmem:[%s8983_s4 + $0x840] sm:$0xff]  }
 0x376   :  { %6569 = vmatpush3.bf16.msra.mxu1 %v7105_v6  ;;  %v7159_v6 = vld [vmem:[%s8983_s4 + $0x6b0] sm:$0xff]  }
 0x377   :  { %6570 = vmatprep.subr.bf16.mxu1 %v7108_v7  ;;  %v7162_v7 = vld [vmem:[%s8983_s4 + $0x6f8] sm:$0xff]  }
 0x378   :  { %6591 = vmatpush3.bf16.msra.mxu0 %v7107_v10  ;;  %v7161_v10 = vld [vmem:[%s8983_s4 + $0x638] sm:$0xff]  }
 0x379   :  { %6592 = vmatprep.subr.bf16.mxu0 %v7110_v15  ;;  %v2468_v15 = vcombine.high %v8406_v4, %v8406_v4 }
 0x37a   :  { %6571 = vmatpush3.bf16.msra.mxu1 %v7109_v16  ;;  %v7164_v16 = vld [vmem:[%s8983_s4 + $0x740] sm:$0xff]  }
 0x37b   :  { %6572 = vmatprep.subr.bf16.mxu1 %v7112_v22  ;;  %v7163_v22 = vld [vmem:[%s8983_s4 + $0x6b8] sm:$0xff]  }
 0x37c   :  { %6593 = vmatpush3.bf16.msra.mxu0 %v7111_v19  ;;  %v2475_v19 = vrot.slane %v8300_v8, %v7598_v1  ;;  %v7179_v8 = vld [vmem:[%s8983_s4 + $0x7d8] sm:$0xff]  }
 0x37d   :  { %6594 = vmatprep.subr.bf16.mxu0 %v7114_v21  ;;  %v7167_v21 = vld [vmem:[%s8983_s4 + $0x7c0] sm:$0xff]  }
 0x37e   :  { %6573 = vmatpush3.bf16.msra.mxu1 %v7113_v24  ;;  %v7165_v24 = vld [vmem:[%s8983_s4 + $0x700] sm:$0xff]  }
 0x37f   :  { %6574 = vmatprep.subr.bf16.mxu1 %v7116_v27  ;;  %v2496_v27 = vrot.slane %v2468_v15, %v7598_v1 }
 0x380   :  { %6595 = vmatpush3.bf16.msra.mxu0 %v7115_v28  ;;  %v7169_v28 = vld [vmem:[%s8983_s4 + $0x748] sm:$0xff]  }
 0x381   :  { %6596 = vmatprep.subr.bf16.mxu0 %v7118_v29  ;;  %v7168_v29 = vld [vmem:[%s8983_s4 + $0x780] sm:$0xff]  }
 0x382   :  { %6575 = vmatpush3.bf16.msra.mxu1 %v7117_v30  ;;  %v2497_v30 = vcombine.high %v2475_v19, %v2475_v19 }
 0x383   :  { %6576 = vmatprep.subr.bf16.mxu1 %v7120_v32  ;;  %v7171_v32 = vld [vmem:[%s8983_s4 + $0x7c8] sm:$0xff]  }
 0x384   :  { %6597 = vmatpush3.bf16.msra.mxu0 %v7119_v33  ;;  %v2500_v33 = vcombine.high %v2496_v27, %v2496_v27 }
 0x385   :  { %6598 = vmatprep.subr.bf16.mxu0 %v7122_v34  ;;  %v7170_v34 = vld [vmem:[%s8983_s4 + $0x708] sm:$0xff]  }
 0x386   :  { %6577 = vmatpush3.bf16.msra.mxu1 %v7121_v35  ;;  %v7173_v35 = vld [vmem:[%s8983_s4 + $0x750] sm:$0xff]  }
 0x387   :  { %6578 = vmatprep.subr.bf16.mxu1 %v7124_v36  ;;  %v7172_v36 = vld [vmem:[%s8983_s4 + $0x788] sm:$0xff]  }
 0x388   :  { %6599 = vmatpush3.bf16.msra.mxu0 %v7123_v39  ;;  %v7174_v39 = vld [vmem:[%s8983_s4 + $0x710] sm:$0xff]  }
 0x389   :  { %6600 = vmatprep.subr.bf16.mxu0 %v7126_v20  ;;  %v7177_v20 = vld [vmem:[%s8983_s4 + $0x758] sm:$0xff]  }
 0x38a   :  { %6579 = vmatpush3.bf16.msra.mxu1 %v7125_v40  ;;  %v7176_v40 = vld [vmem:[%s8983_s4 + $0x790] sm:$0xff]  }
 0x38b   :  { %6580 = vmatprep.subr.bf16.mxu1 %v7128_v9  ;;  %v7178_v9 = vld [vmem:[%s8983_s4 + $0x718] sm:$0xff]  }
 0x38c   :  { %6601 = vmatpush3.bf16.msra.mxu0 %v7127_v14  ;;  %v7181_v14 = vld [vmem:[%s8983_s4 + $0x760] sm:$0xff]  }
 0x38d   :  { %6602 = vmatprep.subr.bf16.mxu0 %v7130_v41  ;;  %v7180_v41 = vld [vmem:[%s8983_s4 + $0x798] sm:$0xff]  }
 0x38e   :  { %6581 = vmatpush3.bf16.msra.mxu1 %v7129_v42  ;;  %v7183_v42 = vld [vmem:[%s8983_s4 + $0x7e0] sm:$0xff]  }
 0x38f   :  { %6610 = vmatprep.subr.bf16.mxu1 %v7132_v43  ;;  %v7185_v43 = vld [vmem:[%s8983_s4 + $0x768] sm:$0xff]  }
 0x390   :  { %6603 = vmatpush3.bf16.msra.mxu0 %v7131_v44  ;;  %v7184_v44 = vld [vmem:[%s8983_s4 + $0x7a0] sm:$0xff]  }
 0x391   :  { %5384 = vmatmul.mubr.bf16.vlgmr.msra.gmra.mrb[24].mxu1 %v2433_v31  ;;  %6632 = vmatprep.subr.bf16.mxu0 %v7134_v37  ;;  %v7187_v31 = vld [vmem:[%s8983_s4 + $0x7e8] sm:$0xff]  }
 0x392   :  { %6611 = vmatpush3.bf16.msra.mxu1 %v7133_v45  ;;  %5463 = vmatprep.mubr.bf16.mxu1 %v2489_v11  ;;  %v7186_v37 = vld [vmem:[%s8983_s4 + $0x728] sm:$0xff]   ;;  %v7189_v45 = vld [vmem:[%s8983_s4 + $0x770] sm:$0xff]  }
 0x393   :  { %5424 = vmatmul.mubr.bf16.vlgmr.msra.gmra.mrb[28].mxu0 %v2449_v47  ;;  %6612 = vmatprep.subr.bf16.mxu1 %v7136_v46  ;;  %v8500_v11 = vld [vmem:[#allocation3 + $0x20] sm:$0xff]  ;;  %v5961_v47 = vld [vmem:[%s8984_s5] ss:$0 sm:$0xff] }
 0x394   :  { %6633 = vmatpush3.bf16.msra.mxu0 %v7135_v13  ;;  %5503 = vmatprep.mubr.bf16.mxu0 %v2499_v48  ;;  %v7188_v13 = vld [vmem:[%s8983_s4 + $0x7a8] sm:$0xff]   ;;  %v7191_v48 = vld [vmem:[%s8983_s4 + $0x7f0] sm:$0xff]  }
 0x395   :  { %6634 = vmatprep.subr.bf16.mxu0 %v7138_v17 }
 0x396   :  { %6613 = vmatpush3.bf16.msra.mxu1 %v7137_v18 }
 0x397   :  { %6614 = vmatprep.subr.bf16.mxu1 %v7140_v49 }
 0x398   :  { %6635 = vmatpush3.bf16.msra.mxu0 %v7139_v25 }
 0x399   :  { %6636 = vmatprep.subr.bf16.mxu0 %v7142_v50  ;;  %v7190_v50 = vld [vmem:[%s8983_s4 + $0x730] sm:$0xff]  }
 0x39a   :  { %6615 = vmatpush3.bf16.msra.mxu1 %v7141_v26  ;;  %v8516_v26 = vrot.slane %v8500_v11, %v7598_v1 }
 0x39b   :  { %6616 = vmatprep.subr.bf16.mxu1 %v7144_v51 }
 0x39c   :  { %6637 = vmatpush3.bf16.msra.mxu0 %v7143_v52 }
 0x39d   :  { %6638 = vmatprep.subr.bf16.mxu0 %v7146_v53  ;;  %v7193_v53 = vld [vmem:[%s8983_s4 + $0x778] sm:$0xff]  }
 0x39e   :  { %6617 = vmatpush3.bf16.msra.mxu1 %v7145_v54 }
 0x39f   :  { %6618 = vmatprep.subr.bf16.mxu1 %v7148_v55 }
 0x3a0   :  { %6639 = vmatpush3.bf16.msra.mxu0 %v7147_v12 }
 0x3a1   :  { %6640 = vmatprep.subr.bf16.mxu0 %v7150_v56  ;;  %v7192_v56 = vld [vmem:[%s8983_s4 + $0x7b0] sm:$0xff]  }
 0x3a2   :  { %6619 = vmatpush3.bf16.msra.mxu1 %v7149_v57 }
 0x3a3   :  { %6620 = vmatprep.subr.bf16.mxu1 %v7152_v58  ;;  %v7195_v58 = vld [vmem:[%s8983_s4 + $0x7f8] sm:$0xff]  }
 0x3a4   :  { %6641 = vmatpush3.bf16.msra.mxu0 %v7151_v59 }
 0x3a5   :  { %6642 = vmatprep.subr.bf16.mxu0 %v7154_v60  ;;  %v7194_v60 = vld [vmem:[%s8983_s4 + $0x738] sm:$0xff]  }
 0x3a6   :  { %6621 = vmatpush3.bf16.msra.mxu1 %v7153_v61  ;;  %v2516_v61 = vcombine.high %v8516_v26, %v8516_v26 }
 0x3a7   :  { %6622 = vmatprep.subr.bf16.mxu1 %v7156_v63  ;;  %v7196_v63 = vld [vmem:[%s8983_s4 + $0x7b8] sm:$0xff]  }
 0x3a8   :  { %6643 = vmatpush3.bf16.msra.mxu0 %v7155_v0  ;;  %v2482_v0 = vrot.slane %v8406_v4, %v7598_v1  ;;  %v7200_v4 = vld [vmem:[%s8983_s4 + $0x880] sm:$0xff]  }
 0x3a9   :  { %6644 = vmatprep.subr.bf16.mxu0 %v7158_v2  ;;  %v7199_v2 = vld [vmem:[%s8983_s4 + $0x8c0] sm:$0xff]  }
 0x3aa   :  { %6623 = vmatpush3.bf16.msra.mxu1 %v7157_v3  ;;  %v7198_v3 = vld [vmem:[%s8983_s4 + $0x800] sm:$0xff]  }
 0x3ab   :  { %6624 = vmatprep.subr.bf16.mxu1 %v7160_v5  ;;  %v2538_v5 = vrot.slane %v2516_v61, %v7598_v1  ;;  %v7235_v61 = vld [vmem:[%s8983_s4 + $0x908] sm:$0xff]  }
 0x3ac   :  { %6645 = vmatpush3.bf16.msra.mxu0 %v7159_v6  ;;  %v7201_v6 = vld [vmem:[%s8983_s4 + $0x848] sm:$0xff]  }
 0x3ad   :  { %6646 = vmatprep.subr.bf16.mxu0 %v7162_v7  ;;  %v2498_v7 = vcombine.high %v2482_v0, %v2482_v0  ;;  %v2548_v15 = vcombine.high %v2538_v5, %v2538_v5 }
 0x3ae   :  { %6625 = vmatpush3.bf16.msra.mxu1 %v7161_v10  ;;  %v7203_v10 = vld [vmem:[%s8983_s4 + $0x8c8] sm:$0xff]  }
 0x3af   :  { %6654 = vmatprep.subr.bf16.mxu1 %v7164_v16  ;;  %v7202_v16 = vld [vmem:[%s8983_s4 + $0x808] sm:$0xff]  }
 0x3b0   :  { %6647 = vmatpush3.bf16.msra.mxu0 %v7163_v22  ;;  %v7205_v22 = vld [vmem:[%s8983_s4 + $0x850] sm:$0xff]  }
 0x3b1   :  { %5464 = vmatmul.mubr.bf16.vlgmr.msra.gmra.mrb[28].mxu1 %v2475_v19  ;;  %6676 = vmatprep.subr.bf16.mxu0 %v7167_v21  ;;  %v7204_v19 = vld [vmem:[%s8983_s4 + $0x888] sm:$0xff]   ;;  %v7207_v21 = vld [vmem:[%s8983_s4 + $0x8d0] sm:$0xff]  }
 0x3b2   :  { %6655 = vmatpush3.bf16.msra.mxu1 %v7165_v24  ;;  %5543 = vmatprep.mubr.bf16.mxu1 %v2496_v27  ;;  %v7206_v24 = vld [vmem:[%s8983_s4 + $0x810] sm:$0xff]   ;;  %v7209_v27 = vld [vmem:[%s8983_s4 + $0x858] sm:$0xff]  }
 0x3b3   :  { %5504 = vmatmul.mubr.bf16.vlgmr.msra.gmra.mrb[32].mxu0 %v2497_v30  ;;  %6656 = vmatprep.subr.bf16.mxu1 %v7169_v28  ;;  %v7208_v28 = vld [vmem:[%s8983_s4 + $0x890] sm:$0xff]   ;;  %v7210_v30 = vld [vmem:[%s8983_s4 + $0x818] sm:$0xff]  }
 0x3b4   :  { %6677 = vmatpush3.bf16.msra.mxu0 %v7168_v29  ;;  %5583 = vmatprep.mubr.bf16.mxu0 %v2500_v33  ;;  %v7211_v29 = vld [vmem:[%s8983_s4 + $0x8d8] sm:$0xff]  }
 0x3b5   :  { %6678 = vmatprep.subr.bf16.mxu0 %v7171_v32  ;;  %v7213_v32 = vld [vmem:[%s8983_s4 + $0x860] sm:$0xff]   ;;  %v7212_v33 = vld [vmem:[%s8983_s4 + $0x898] sm:$0xff]  }
 0x3b6   :  { %6657 = vmatpush3.bf16.msra.mxu1 %v7170_v34  ;;  %v7215_v34 = vld [vmem:[%s8983_s4 + $0x8e0] sm:$0xff]  }
 0x3b7   :  { %6658 = vmatprep.subr.bf16.mxu1 %v7173_v35  ;;  %v7214_v35 = vld [vmem:[%s8983_s4 + $0x820] sm:$0xff]  }
 0x3b8   :  { %6679 = vmatpush3.bf16.msra.mxu0 %v7172_v36  ;;  %v7217_v36 = vld [vmem:[%s8983_s4 + $0x868] sm:$0xff]  }
 0x3b9   :  { %6680 = vmatprep.subr.bf16.mxu0 %v7175_v38  ;;  %v7216_v38 = vld [vmem:[%s8983_s4 + $0x8a0] sm:$0xff]  }
 0x3ba   :  { %6659 = vmatpush3.bf16.msra.mxu1 %v7174_v39  ;;  %v7219_v39 = vld [vmem:[%s8983_s4 + $0x8e8] sm:$0xff]  }
 0x3bb   :  { %6660 = vmatprep.subr.bf16.mxu1 %v7177_v20  ;;  %v7218_v20 = vld [vmem:[%s8983_s4 + $0x828] sm:$0xff]  }
 0x3bc   :  { %6681 = vmatpush3.bf16.msra.mxu0 %v7176_v40  ;;  %v2501_v40 = vcombine.high %v8500_v11, %v8500_v11 }
 0x3bd   :  { %6682 = vmatprep.subr.bf16.mxu0 %v7179_v8  ;;  %v7221_v8 = vld [vmem:[%s8983_s4 + $0x870] sm:$0xff]  }
 0x3be   :  { %6661 = vmatpush3.bf16.msra.mxu1 %v7178_v9 }
 0x3bf   :  { %6662 = vmatprep.subr.bf16.mxu1 %v7181_v14  ;;  %v7220_v14 = vld [vmem:[%s8983_s4 + $0x8a8] sm:$0xff]  }
 0x3c0   :  { %6683 = vmatpush3.bf16.msra.mxu0 %v7180_v41 }
 0x3c1   :  { %6684 = vmatprep.subr.bf16.mxu0 %v7183_v42  ;;  %v7223_v42 = vld [vmem:[%s8983_s4 + $0x8f0] sm:$0xff]  }
 0x3c2   :  { %6663 = vmatpush3.bf16.msra.mxu1 %v7182_v23 }
 0x3c3   :  { %6664 = vmatprep.subr.bf16.mxu1 %v7185_v43 }
 0x3c4   :  { %6685 = vmatpush3.bf16.msra.mxu0 %v7184_v44  ;;  %v6362_v46 = vpop.f32.mrb[4].mxu1 }
 0x3c5   :  { %v6363_v17 = vpop.f32.mrb[5].mxu1  ;;  %6686 = vmatprep.subr.bf16.mxu0 %v7187_v31  ;;  %v7222_v31 = vld [vmem:[%s8983_s4 + $0x830] sm:$0xff]  }
 0x3c6   :  { %v6364_v18 = vadd.f32 %v6363_v17, %v6362_v46  ;;  %6665 = vmatpush3.bf16.msra.mxu1 %v7186_v37  ;;  %v6365_v49 = vpop.f32.mrb[6].mxu1  ;;  %v6384_v25 = vpop.f32.mrb[8].mxu0  ;;  %v8624_v37 = vrot.slane %v2501_v40, %v7598_v1  ;;  %v7225_v46 = vld [vmem:[%s8983_s4 + $0x878] sm:$0xff]  }
 0x3c7   :  { %v6366_v51 = vpop.f32.mrb[7].mxu1  ;;  %v6385_v52 = vpop.f32.mrb[9].mxu0  ;;  %6666 = vmatprep.subr.bf16.mxu1 %v7189_v45  ;;  %v7227_v49 = vld [vmem:[%s8983_s4 + $0x8f8] sm:$0xff]  }
 0x3c8   :  { %v4986_v54 = vadd.f32 %v6364_v18, %v5961_v47  ;;  %v6386_v55 = vadd.f32 %v6385_v52, %v6384_v25  ;;  %6687 = vmatpush3.bf16.msra.mxu0 %v7188_v13  ;;  %v6387_v12 = vpop.f32.mrb[10].mxu0  ;;  %v2517_v51 = vcombine.high %v8624_v37, %v8624_v37  ;;  %v7229_v52 = vld [vmem:[%s8983_s4 + $0x940] sm:$0xff]  }
 0x3c9   :  { %v6388_v57 = vpop.f32.mrb[11].mxu0  ;;  %6688 = vmatprep.subr.bf16.mxu0 %v7191_v48  ;;  %v7224_v48 = vld [vmem:[%s8983_s4 + $0x8b0] sm:$0xff]   ;;  %v7230_v12 = vld [vmem:[%s8983_s4 + $0x900] sm:$0xff]  }
 0x3ca   :  { %v8527_v59 = vadd.f32 %v6386_v55, %v4986_v54  ;;  %6667 = vmatpush3.bf16.msra.mxu1 %v7190_v50  ;;  %v7226_v50 = vld [vmem:[%s8983_s4 + $0x838] sm:$0xff]   ;;  %v2524_v54 = vrot.slane %v8516_v26, %v7598_v1  ;;  %v7232_v55 = vld [vmem:[%s8983_s4 + $0x9c0] sm:$0xff]   ;;  %v7234_v57 = vld [vmem:[%s8983_s4 + $0x948] sm:$0xff]  }
 0x3cb   :  { %6668 = vmatprep.subr.bf16.mxu1 %v7193_v53  ;;  %v7228_v53 = vld [vmem:[%s8983_s4 + $0x8b8] sm:$0xff]   ;;  %v7233_v26 = vld [vmem:[%s8983_s4 + $0x980] sm:$0xff]  }
 0x3cc   :  { %6689 = vmatpush3.bf16.msra.mxu0 %v7192_v56  ;;  %v2545_v56 = vrot.slane %v2517_v51, %v7598_v1  ;;  %v7267_v51 = vld [vmem:[%s8983_s4 + $0xa08] sm:$0xff]  }
 0x3cd   :  { %6690 = vmatprep.subr.bf16.mxu0 %v7195_v58  ;;  %v2546_v58 = vcombine.high %v2524_v54, %v2524_v54 }
 0x3ce   :  { %6669 = vmatpush3.bf16.msra.mxu1 %v7194_v60  ;;  %v2549_v60 = vcombine.high %v2545_v56, %v2545_v56 }
 0x3cf   :  { %6698 = vmatprep.subr.bf16.mxu1 %v7197_v62  ;;  %v7238_v62 = vld [vmem:[%s8983_s4 + $0x950] sm:$0xff]  }
 0x3d0   :  { %6691 = vmatpush3.bf16.msra.mxu0 %v7196_v63  ;;  %v7237_v63 = vld [vmem:[%s8983_s4 + $0x988] sm:$0xff]  }
 0x3d1   :  { %5544 = vmatmul.mubr.bf16.vlgmr.msra.gmra.mrb[32].mxu1 %v2482_v0  ;;  %6720 = vmatprep.subr.bf16.mxu0 %v7199_v2  ;;  %v7240_v0 = vld [vmem:[%s8983_s4 + $0x9d0] sm:$0xff]  }
 0x3d2   :  { %6699 = vmatpush3.bf16.msra.mxu1 %v7198_v3  ;;  %5623 = vmatprep.mubr.bf16.mxu1 %v2538_v5  ;;  %v7239_v2 = vld [vmem:[%s8983_s4 + $0x910] sm:$0xff]   ;;  %v7242_v3 = vld [vmem:[%s8983_s4 + $0x958] sm:$0xff]  }
 0x3d3   :  { %5584 = vmatmul.mubr.bf16.vlgmr.msra.gmra.mrb[36].mxu0 %v2498_v7  ;;  %6700 = vmatprep.subr.bf16.mxu1 %v7201_v6  ;;  %v7241_v5 = vld [vmem:[%s8983_s4 + $0x990] sm:$0xff]   ;;  %v7244_v6 = vld [vmem:[%s8983_s4 + $0x9d8] sm:$0xff]   ;;  %v7246_v7 = vld [vmem:[%s8983_s4 + $0x960] sm:$0xff]  }
 0x3d4   :  { %6721 = vmatpush3.bf16.msra.mxu0 %v7200_v4  ;;  %5663 = vmatprep.mubr.bf16.mxu0 %v2548_v15  ;;  %v7243_v4 = vld [vmem:[%s8983_s4 + $0x918] sm:$0xff]   ;;  %v7248_v15 = vld [vmem:[%s8983_s4 + $0x9e0] sm:$0xff]  }
 0x3d5   :  { %6722 = vmatprep.subr.bf16.mxu0 %v7203_v10  ;;  %v7245_v10 = vld [vmem:[%s8983_s4 + $0x998] sm:$0xff]  }
 0x3d6   :  { %6701 = vmatpush3.bf16.msra.mxu1 %v7202_v16  ;;  %v7247_v16 = vld [vmem:[%s8983_s4 + $0x920] sm:$0xff]  }
 0x3d7   :  { %6702 = vmatprep.subr.bf16.mxu1 %v7205_v22  ;;  %v7250_v22 = vld [vmem:[%s8983_s4 + $0x968] sm:$0xff]  }
 0x3d8   :  { %6723 = vmatpush3.bf16.msra.mxu0 %v7204_v19  ;;  %v7249_v19 = vld [vmem:[%s8983_s4 + $0x9a0] sm:$0xff]  }
 0x3d9   :  { %6724 = vmatprep.subr.bf16.mxu0 %v7207_v21  ;;  %v7252_v21 = vld [vmem:[%s8983_s4 + $0x9e8] sm:$0xff]  }
 0x3da   :  { %6703 = vmatpush3.bf16.msra.mxu1 %v7206_v24  ;;  %v7251_v24 = vld [vmem:[%s8983_s4 + $0x928] sm:$0xff]  }
 0x3db   :  { %6704 = vmatprep.subr.bf16.mxu1 %v7209_v27  ;;  %v7254_v27 = vld [vmem:[%s8983_s4 + $0x970] sm:$0xff]  }
 0x3dc   :  { %6725 = vmatpush3.bf16.msra.mxu0 %v7208_v28  ;;  %v8721_v28 = vld [vmem:[#allocation3 + $0x28] sm:$0xff] }
 0x3dd   :  { %6726 = vmatprep.subr.bf16.mxu0 %v7211_v29 }
 0x3de   :  { %6705 = vmatpush3.bf16.msra.mxu1 %v7210_v30  ;;  %v7253_v30 = vld [vmem:[%s8983_s4 + $0x9a8] sm:$0xff]  }
 0x3df   :  { %6706 = vmatprep.subr.bf16.mxu1 %v7213_v32 }
 0x3e0   :  { %6727 = vmatpush3.bf16.msra.mxu0 %v7212_v33  ;;  %v7256_v33 = vld [vmem:[%s8983_s4 + $0x9f0] sm:$0xff]  }
 0x3e1   :  { %6728 = vmatprep.subr.bf16.mxu0 %v7215_v34 }
 0x3e2   :  { %6707 = vmatpush3.bf16.msra.mxu1 %v7214_v35 }
 0x3e3   :  { %6708 = vmatprep.subr.bf16.mxu1 %v7217_v36 }
 0x3e4   :  { %v6406_v9 = vpop.f32.mrb[8].mxu1  ;;  %6729 = vmatpush3.bf16.msra.mxu0 %v7216_v38  ;;  %v7255_v38 = vld [vmem:[%s8983_s4 + $0x930] sm:$0xff]  }
 0x3e5   :  { %v6407_v41 = vpop.f32.mrb[9].mxu1  ;;  %6730 = vmatprep.subr.bf16.mxu0 %v7219_v39  ;;  %v8734_v39 = vrot.slane %v8721_v28, %v7598_v1 }
 0x3e6   :  { %v6408_v23 = vadd.f32 %v6407_v41, %v6406_v9  ;;  %v6409_v43 = vpop.f32.mrb[10].mxu1  ;;  %v6428_v44 = vpop.f32.mrb[12].mxu0  ;;  %6709 = vmatpush3.bf16.msra.mxu1 %v7218_v20 }
 0x3e7   :  { %v6410_v45 = vpop.f32.mrb[11].mxu1  ;;  %v6429_v11 = vpop.f32.mrb[13].mxu0  ;;  %6710 = vmatprep.subr.bf16.mxu1 %v7221_v8  ;;  %v7258_v8 = vld [vmem:[%s8983_s4 + $0x978] sm:$0xff]  }
 0x3e8   :  { %v5066_v13 = vadd.f32 %v6408_v23, %v8527_v59  ;;  %v6430_v47 = vadd.f32 %v6429_v11, %v6428_v44  ;;  %v6431_v17 = vpop.f32.mrb[14].mxu0  ;;  %6731 = vmatpush3.bf16.msra.mxu0 %v7220_v14  ;;  %v7236_v59 = vld [vmem:[%s8983_s4 + $0x9c8] sm:$0xff]   ;;  %v7260_v43 = vld [vmem:[%s8983_s4 + $0x9f8] sm:$0xff]   ;;  %v2565_v45 = vcombine.high %v8734_v39, %v8734_v39  ;;  %v7262_v11 = vld [vmem:[%s8983_s4 + $0xa40] sm:$0xff]  }
 0x3e9   :  { %v6432_v18 = vpop.f32.mrb[15].mxu0  ;;  %6732 = vmatprep.subr.bf16.mxu0 %v7223_v42  ;;  %v7257_v42 = vld [vmem:[%s8983_s4 + $0x9b0] sm:$0xff]   ;;  %v7263_v17 = vld [vmem:[%s8983_s4 + $0xa00] sm:$0xff]  }
 0x3ea   :  { %v8636_v25 = vadd.f32 %v6430_v47, %v5066_v13  ;;  %6711 = vmatpush3.bf16.msra.mxu1 %v7222_v31  ;;  %v7259_v31 = vld [vmem:[%s8983_s4 + $0x938] sm:$0xff]   ;;  %v2531_v13 = vrot.slane %v8624_v37, %v7598_v1  ;;  %v7264_v47 = vld [vmem:[%s8983_s4 + $0xac0] sm:$0xff]   ;;  %v7266_v18 = vld [vmem:[%s8983_s4 + $0xa48] sm:$0xff]  }
 0x3eb   :  { %6712 = vmatprep.subr.bf16.mxu1 %v7225_v46  ;;  %v7261_v46 = vld [vmem:[%s8983_s4 + $0x9b8] sm:$0xff]   ;;  %v7265_v37 = vld [vmem:[%s8983_s4 + $0xa80] sm:$0xff]  }
 0x3ec   :  { %6733 = vmatpush3.bf16.msra.mxu0 %v7224_v48  ;;  %v2587_v48 = vrot.slane %v2565_v45, %v7598_v1  ;;  %v7300_v45 = vld [vmem:[%s8983_s4 + $0xb08] sm:$0xff]  }
 0x3ed   :  { %6734 = vmatprep.subr.bf16.mxu0 %v7227_v49  ;;  %v2547_v49 = vcombine.high %v2531_v13, %v2531_v13 }
 0x3ee   :  { %6713 = vmatpush3.bf16.msra.mxu1 %v7226_v50  ;;  %v2597_v50 = vcombine.high %v2587_v48, %v2587_v48 }
 0x3ef   :  { %6742 = vmatprep.subr.bf16.mxu1 %v7229_v52  ;;  %v7270_v52 = vld [vmem:[%s8983_s4 + $0xa50] sm:$0xff]  }
 0x3f0   :  { %6735 = vmatpush3.bf16.msra.mxu0 %v7228_v53  ;;  %v7269_v53 = vld [vmem:[%s8983_s4 + $0xa88] sm:$0xff]  }
 0x3f1   :  { %5624 = vmatmul.mubr.bf16.vlgmr.msra.gmra.mrb[36].mxu1 %v2524_v54  ;;  %6764 = vmatprep.subr.bf16.mxu0 %v7232_v55  ;;  %v7272_v54 = vld [vmem:[%s8983_s4 + $0xad0] sm:$0xff]  }
 0x3f2   :  { %6743 = vmatpush3.bf16.msra.mxu1 %v7230_v12  ;;  %5703 = vmatprep.mubr.bf16.mxu1 %v2545_v56  ;;  %v7271_v55 = vld [vmem:[%s8983_s4 + $0xa10] sm:$0xff]   ;;  %v7274_v12 = vld [vmem:[%s8983_s4 + $0xa58] sm:$0xff]  }
 0x3f3   :  { %5664 = vmatmul.mubr.bf16.vlgmr.msra.gmra.mrb[40].mxu0 %v2546_v58  ;;  %6744 = vmatprep.subr.bf16.mxu1 %v7234_v57  ;;  %v7273_v56 = vld [vmem:[%s8983_s4 + $0xa90] sm:$0xff]   ;;  %v7276_v57 = vld [vmem:[%s8983_s4 + $0xad8] sm:$0xff]   ;;  %v7278_v58 = vld [vmem:[%s8983_s4 + $0xa60] sm:$0xff]  }
 0x3f4   :  { %6765 = vmatpush3.bf16.msra.mxu0 %v7233_v26  ;;  %5743 = vmatprep.mubr.bf16.mxu0 %v2549_v60  ;;  %v7275_v26 = vld [vmem:[%s8983_s4 + $0xa18] sm:$0xff]   ;;  %v7280_v60 = vld [vmem:[%s8983_s4 + $0xae0] sm:$0xff]  }
 0x3f5   :  { %6766 = vmatprep.subr.bf16.mxu0 %v7236_v59  ;;  %v7277_v59 = vld [vmem:[%s8983_s4 + $0xa98] sm:$0xff]  }
 0x3f6   :  { %6745 = vmatpush3.bf16.msra.mxu1 %v7235_v61  ;;  %v7279_v61 = vld [vmem:[%s8983_s4 + $0xa20] sm:$0xff]  }
 0x3f7   :  { %6746 = vmatprep.subr.bf16.mxu1 %v7238_v62  ;;  %v7282_v62 = vld [vmem:[%s8983_s4 + $0xa68] sm:$0xff]  }
 0x3f8   :  { %6767 = vmatpush3.bf16.msra.mxu0 %v7237_v63  ;;  %v7281_v63 = vld [vmem:[%s8983_s4 + $0xaa0] sm:$0xff]  }
 0x3f9   :  { %6768 = vmatprep.subr.bf16.mxu0 %v7240_v0  ;;  %v7284_v0 = vld [vmem:[%s8983_s4 + $0xae8] sm:$0xff]  }
 0x3fa   :  { %6747 = vmatpush3.bf16.msra.mxu1 %v7239_v2  ;;  %v7283_v2 = vld [vmem:[%s8983_s4 + $0xa28] sm:$0xff]  }
 0x3fb   :  { %6748 = vmatprep.subr.bf16.mxu1 %v7242_v3  ;;  %v2550_v3 = vcombine.high %v8721_v28, %v8721_v28  ;;  %v7290_v28 = vld [vmem:[%s8983_s4 + $0xa78] sm:$0xff]  }
 0x3fc   :  { %6769 = vmatpush3.bf16.msra.mxu0 %v7241_v5  ;;  %v7286_v5 = vld [vmem:[%s8983_s4 + $0xa70] sm:$0xff]  }
 0x3fd   :  { %6770 = vmatprep.subr.bf16.mxu0 %v7244_v6 }
 0x3fe   :  { %6749 = vmatpush3.bf16.msra.mxu1 %v7243_v4  ;;  %v7285_v4 = vld [vmem:[%s8983_s4 + $0xaa8] sm:$0xff]  }
 0x3ff   :  { %6750 = vmatprep.subr.bf16.mxu1 %v7246_v7 }
 0x400   :  { %6771 = vmatpush3.bf16.msra.mxu0 %v7245_v10  ;;  %v7288_v10 = vld [vmem:[%s8983_s4 + $0xaf0] sm:$0xff]  }
 0x401   :  { %6772 = vmatprep.subr.bf16.mxu0 %v7248_v15 }
 0x402   :  { %6751 = vmatpush3.bf16.msra.mxu1 %v7247_v16 }
 0x403   :  { %6752 = vmatprep.subr.bf16.mxu1 %v7250_v22 }
 0x404   :  { %v6450_v29 = vpop.f32.mrb[12].mxu1  ;;  %6773 = vmatpush3.bf16.msra.mxu0 %v7249_v19  ;;  %v7287_v19 = vld [vmem:[%s8983_s4 + $0xa30] sm:$0xff]  }
 0x405   :  { %v6451_v32 = vpop.f32.mrb[13].mxu1  ;;  %6774 = vmatprep.subr.bf16.mxu0 %v7252_v21  ;;  %v8843_v21 = vrot.slane %v2550_v3, %v7598_v1 }
 0x406   :  { %v6452_v34 = vadd.f32 %v6451_v32, %v6450_v29  ;;  %v6453_v35 = vpop.f32.mrb[14].mxu1  ;;  %v6472_v36 = vpop.f32.mrb[16].mxu0  ;;  %6753 = vmatpush3.bf16.msra.mxu1 %v7251_v24 }
 0x407   :  { %v6454_v20 = vpop.f32.mrb[15].mxu1  ;;  %v6473_v40 = vpop.f32.mrb[17].mxu0  ;;  %6754 = vmatprep.subr.bf16.mxu1 %v7254_v27  ;;  %v7292_v35 = vld [vmem:[%s8983_s4 + $0xaf8] sm:$0xff]  }
 0x408   :  { %v5146_v9 = vadd.f32 %v6452_v34, %v8636_v25  ;;  %v6474_v14 = vadd.f32 %v6473_v40, %v6472_v36  ;;  %v6475_v41 = vpop.f32.mrb[18].mxu0  ;;  %6775 = vmatpush3.bf16.msra.mxu0 %v7253_v30  ;;  %v7268_v25 = vld [vmem:[%s8983_s4 + $0xac8] sm:$0xff]   ;;  %v2566_v20 = vcombine.high %v8843_v21, %v8843_v21  ;;  %v7294_v40 = vld [vmem:[%s8983_s4 + $0xb40] sm:$0xff]  }
 0x409   :  { %v6476_v23 = vpop.f32.mrb[19].mxu0  ;;  %6776 = vmatprep.subr.bf16.mxu0 %v7256_v33  ;;  %v7289_v33 = vld [vmem:[%s8983_s4 + $0xab0] sm:$0xff]   ;;  %v7295_v41 = vld [vmem:[%s8983_s4 + $0xb00] sm:$0xff]  }
 0x40a   :  { %v8746_v44 = vadd.f32 %v6474_v14, %v5146_v9  ;;  %6755 = vmatpush3.bf16.msra.mxu1 %v7255_v38  ;;  %v7291_v38 = vld [vmem:[%s8983_s4 + $0xa38] sm:$0xff]   ;;  %v2573_v9 = vrot.slane %v8734_v39, %v7598_v1  ;;  %v7297_v14 = vld [vmem:[%s8983_s4 + $0xbc0] sm:$0xff]   ;;  %v7299_v23 = vld [vmem:[%s8983_s4 + $0xb48] sm:$0xff]  }
 0x40b   :  { %6756 = vmatprep.subr.bf16.mxu1 %v7258_v8  ;;  %v7293_v8 = vld [vmem:[%s8983_s4 + $0xab8] sm:$0xff]   ;;  %v7298_v39 = vld [vmem:[%s8983_s4 + $0xb80] sm:$0xff]  }
 0x40c   :  { %6777 = vmatpush3.bf16.msra.mxu0 %v7257_v42  ;;  %v2594_v42 = vrot.slane %v2566_v20, %v7598_v1 }
 0x40d   :  { %6778 = vmatprep.subr.bf16.mxu0 %v7260_v43  ;;  %v2595_v43 = vcombine.high %v2573_v9, %v2573_v9 }
 0x40e   :  { %6757 = vmatpush3.bf16.msra.mxu1 %v7259_v31  ;;  %v2598_v31 = vcombine.high %v2594_v42, %v2594_v42 }
 0x40f   :  { %6786 = vmatprep.subr.bf16.mxu1 %v7262_v11  ;;  %v7303_v11 = vld [vmem:[%s8983_s4 + $0xb50] sm:$0xff]  }
 0x410   :  { %6779 = vmatpush3.bf16.msra.mxu0 %v7261_v46  ;;  %v7302_v46 = vld [vmem:[%s8983_s4 + $0xb88] sm:$0xff]  }
 0x411   :  { %5704 = vmatmul.mubr.bf16.vlgmr.msra.gmra.mrb[40].mxu1 %v2531_v13  ;;  %6808 = vmatprep.subr.bf16.mxu0 %v7264_v47  ;;  %v7305_v13 = vld [vmem:[%s8983_s4 + $0xbd0] sm:$0xff]  }
 0x412   :  { %6787 = vmatpush3.bf16.msra.mxu1 %v7263_v17  ;;  %5783 = vmatprep.mubr.bf16.mxu1 %v2587_v48  ;;  %v7304_v47 = vld [vmem:[%s8983_s4 + $0xb10] sm:$0xff]   ;;  %v7307_v17 = vld [vmem:[%s8983_s4 + $0xb58] sm:$0xff]  }
 0x413   :  { %5744 = vmatmul.mubr.bf16.vlgmr.msra.gmra.mrb[44].mxu0 %v2547_v49  ;;  %6788 = vmatprep.subr.bf16.mxu1 %v7266_v18  ;;  %v7306_v48 = vld [vmem:[%s8983_s4 + $0xb90] sm:$0xff]   ;;  %v7309_v18 = vld [vmem:[%s8983_s4 + $0xbd8] sm:$0xff]   ;;  %v7311_v49 = vld [vmem:[%s8983_s4 + $0xb60] sm:$0xff]  }
 0x414   :  { %6809 = vmatpush3.bf16.msra.mxu0 %v7265_v37  ;;  %5823 = vmatprep.mubr.bf16.mxu0 %v2597_v50  ;;  %v7308_v37 = vld [vmem:[%s8983_s4 + $0xb18] sm:$0xff]   ;;  %v7313_v50 = vld [vmem:[%s8983_s4 + $0xbe0] sm:$0xff]  }
 0x415   :  { %6810 = vmatprep.subr.bf16.mxu0 %v7268_v25  ;;  %v7310_v25 = vld [vmem:[%s8983_s4 + $0xb98] sm:$0xff]  }
 0x416   :  { %6789 = vmatpush3.bf16.msra.mxu1 %v7267_v51  ;;  %v7312_v51 = vld [vmem:[%s8983_s4 + $0xb20] sm:$0xff]  }
 0x417   :  { %6790 = vmatprep.subr.bf16.mxu1 %v7270_v52  ;;  %v7315_v52 = vld [vmem:[%s8983_s4 + $0xb68] sm:$0xff]  }
 0x418   :  { %6811 = vmatpush3.bf16.msra.mxu0 %v7269_v53  ;;  %v7314_v53 = vld [vmem:[%s8983_s4 + $0xba0] sm:$0xff]  }
 0x419   :  { %6812 = vmatprep.subr.bf16.mxu0 %v7272_v54  ;;  %v7317_v54 = vld [vmem:[%s8983_s4 + $0xbe8] sm:$0xff]  }
 0x41a   :  { %6791 = vmatpush3.bf16.msra.mxu1 %v7271_v55  ;;  %v7316_v55 = vld [vmem:[%s8983_s4 + $0xb28] sm:$0xff]  }
 0x41b   :  { %6792 = vmatprep.subr.bf16.mxu1 %v7274_v12  ;;  %v7319_v12 = vld [vmem:[%s8983_s4 + $0xb70] sm:$0xff]  }
 0x41c   :  { %6813 = vmatpush3.bf16.msra.mxu0 %v7273_v56 }
 0x41d   :  { %6814 = vmatprep.subr.bf16.mxu0 %v7276_v57  ;;  %v7318_v57 = vld [vmem:[%s8983_s4 + $0xba8] sm:$0xff]  }
 0x41e   :  { %6793 = vmatpush3.bf16.msra.mxu1 %v7275_v26 }
 0x41f   :  { %6794 = vmatprep.subr.bf16.mxu1 %v7278_v58  ;;  %v7321_v58 = vld [vmem:[%s8983_s4 + $0xbf0] sm:$0xff]  }
 0x420   :  { %6815 = vmatpush3.bf16.msra.mxu0 %v7277_v59 }
 0x421   :  { %6816 = vmatprep.subr.bf16.mxu0 %v7280_v60 }
 0x422   :  { %6795 = vmatpush3.bf16.msra.mxu1 %v7279_v61 }
 0x423   :  { %6796 = vmatprep.subr.bf16.mxu1 %v7282_v62  ;;  %v7320_v62 = vld [vmem:[%s8983_s4 + $0xb30] sm:$0xff]  }
 0x424   :  { %v6494_v6 = vpop.f32.mrb[16].mxu1  ;;  %6817 = vmatpush3.bf16.msra.mxu0 %v7281_v63 }
 0x425   :  { %v6495_v7 = vpop.f32.mrb[17].mxu1  ;;  %6818 = vmatprep.subr.bf16.mxu0 %v7284_v0 }
 0x426   :  { %v6496_v15 = vadd.f32 %v6495_v7, %v6494_v6  ;;  %v6497_v16 = vpop.f32.mrb[18].mxu1  ;;  %v6516_v22 = vpop.f32.mrb[20].mxu0  ;;  %6797 = vmatpush3.bf16.msra.mxu1 %v7283_v2  ;;  %v7323_v2 = vld [vmem:[%s8983_s4 + $0xb78] sm:$0xff]  }
 0x427   :  { %v6498_v24 = vpop.f32.mrb[19].mxu1  ;;  %v6517_v27 = vpop.f32.mrb[21].mxu0  ;;  %6798 = vmatprep.subr.bf16.mxu1 %v7286_v5  ;;  %v7324_v16 = vld [vmem:[%s8983_s4 + $0xb38] sm:$0xff]  }
 0x428   :  { %v5226_v29 = vadd.f32 %v6496_v15, %v8746_v44  ;;  %v6518_v30 = vadd.f32 %v6517_v27, %v6516_v22  ;;  %v6519_v32 = vpop.f32.mrb[22].mxu0  ;;  %6819 = vmatpush3.bf16.msra.mxu0 %v7285_v4  ;;  %v7301_v44 = vld [vmem:[%s8983_s4 + $0xbc8] sm:$0xff]   ;;  %v7322_v4 = vld [vmem:[%s8983_s4 + $0xbb0] sm:$0xff]   ;;  %v7326_v22 = vld [vmem:[%s8983_s4 + $0xbb8] sm:$0xff]  }
 0x429   :  { %v6520_v34 = vpop.f32.mrb[23].mxu0  ;;  %6820 = vmatprep.subr.bf16.mxu0 %v7288_v10  ;;  %v7325_v10 = vld [vmem:[%s8983_s4 + $0xbf8] sm:$0xff]   ;;  %s7357_s4 = smov [#allocation4]  }
 0x42a   :  { %v8855_v36 = vadd.f32 %v6518_v30, %v5226_v29  ;;  %6799 = vmatpush3.bf16.msra.mxu1 %v7287_v19  ;;  %v2580_v19 = vrot.slane %v8843_v21, %v7598_v1  ;;  %s5919_s20 = sshll.u32 %s7357_s4, 4  ;;  %s5920_s20 = int_to_ptr.vmem [resolvable:$true] %s5919_s20 }
 0x42b   :  { %6800 = vmatprep.subr.bf16.mxu1 %v7290_v28  ;;  %s7331_s21 = scalar_lea.vmem %s5920_s20, 32  ;;  %p7336_p1 = scmp.lt.s32.totalorder %s5920_s20, %s5920_s20 }
 0x42c   :  { %6821 = vmatpush3.bf16.msra.mxu0 %v7289_v33  ;;  %v2596_v24 = vcombine.high %v2580_v19, %v2580_v19  ;;  %p7332_p0 = scmp.ne.s32.totalorder %s5920_s20, %s7331_s21  ;;  %p7337_p2 = scmp.lt.s32.totalorder %s7331_s21, %s7331_s21 }
 0x42d   :  { %6822 = vmatprep.subr.bf16.mxu0 %v7292_v35 }
 0x42e   :  { %6801 = vmatpush3.bf16.msra.mxu1 %v7291_v38  ;;  %p7338_p3 = por %p7337_p2, %p7336_p1 }
 0x42f   :  { %6830 = vmatprep.subr.bf16.mxu1 %v7294_v40 }
 0x430   :  { %6823 = vmatpush3.bf16.msra.mxu0 %v7293_v8  ;;  %p7339_p4 = pnand %p7338_p3, %p7332_p0 }
 0x431   :  { %5784 = vmatmul.mubr.bf16.vlgmr.msra.gmra.mrb[44].mxu1 %v2573_v9  ;;  %6852 = vmatprep.subr.bf16.mxu0 %v7297_v14 }
 0x432   :  { %6831 = vmatpush3.bf16.msra.mxu1 %v7295_v41  ;;  %5863 = vmatprep.mubr.bf16.mxu1 %v2594_v42 }
 0x433   :  { %5824 = vmatmul.mubr.bf16.vlgmr.msra.gmra.mrb[48].mxu0 %v2595_v43  ;;  %6832 = vmatprep.subr.bf16.mxu1 %v7299_v23 }
 0x434   :  { %6853 = vmatpush3.bf16.msra.mxu0 %v7298_v39  ;;  %5903 = vmatprep.mubr.bf16.mxu0 %v2598_v31 }
 0x435   :  { %6854 = vmatprep.subr.bf16.mxu0 %v7301_v44 }
 0x436   :  { %6833 = vmatpush3.bf16.msra.mxu1 %v7300_v45 }
 0x437   :  { %6834 = vmatprep.subr.bf16.mxu1 %v7303_v11 }
 0x438   :  { %6855 = vmatpush3.bf16.msra.mxu0 %v7302_v46 }
 0x439   :  { %6856 = vmatprep.subr.bf16.mxu0 %v7305_v13 }
 0x43a   :  { %6835 = vmatpush3.bf16.msra.mxu1 %v7304_v47 }
 0x43b   :  { %6836 = vmatprep.subr.bf16.mxu1 %v7307_v17 }
 0x43c   :  { %6857 = vmatpush3.bf16.msra.mxu0 %v7306_v48 }
 0x43d   :  { %6858 = vmatprep.subr.bf16.mxu0 %v7309_v18 }
 0x43e   :  { %6837 = vmatpush3.bf16.msra.mxu1 %v7308_v37 }
 0x43f   :  { %6838 = vmatprep.subr.bf16.mxu1 %v7311_v49 }
 0x440   :  { %6859 = vmatpush3.bf16.msra.mxu0 %v7310_v25 }
 0x441   :  { %6860 = vmatprep.subr.bf16.mxu0 %v7313_v50 }
 0x442   :  { %6839 = vmatpush3.bf16.msra.mxu1 %v7312_v51 }
 0x443   :  { %6840 = vmatprep.subr.bf16.mxu1 %v7315_v52 }
 0x444   :  { %v6538_v56 = vpop.f32.mrb[20].mxu1  ;;  %6861 = vmatpush3.bf16.msra.mxu0 %v7314_v53 }
 0x445   :  { %v6539_v26 = vpop.f32.mrb[21].mxu1  ;;  %6862 = vmatprep.subr.bf16.mxu0 %v7317_v54 }
 0x446   :  { %v6540_v59 = vadd.f32 %v6539_v26, %v6538_v56  ;;  %v6541_v60 = vpop.f32.mrb[22].mxu1  ;;  %v6560_v61 = vpop.f32.mrb[24].mxu0  ;;  %6841 = vmatpush3.bf16.msra.mxu1 %v7316_v55 }
 0x447   :  { %v6542_v63 = vpop.f32.mrb[23].mxu1  ;;  %v6561_v0 = vpop.f32.mrb[25].mxu0  ;;  %6842 = vmatprep.subr.bf16.mxu1 %v7319_v12 }
 0x448   :  { %v5306_v3 = vadd.f32 %v6540_v59, %v8855_v36  ;;  %v6562_v5 = vadd.f32 %v6561_v0, %v6560_v61  ;;  %v6563_v6 = vpop.f32.mrb[26].mxu0  ;;  %6863 = vmatpush3.bf16.msra.mxu0 %v7318_v57 }
 0x449   :  { %v6564_v7 = vpop.f32.mrb[27].mxu0  ;;  %6864 = vmatprep.subr.bf16.mxu0 %v7321_v58 }
 0x44a   :  { %v5346_v15 = vadd.f32 %v6562_v5, %v5306_v3  ;;  %6843 = vmatpush3.bf16.msra.mxu1 %v7320_v62 }
 0x44b   :  { %6844 = vmatprep.subr.bf16.mxu1 %v7323_v2 }
 0x44c   :  { %6865 = vmatpush3.bf16.msra.mxu0 %v7322_v4 }
 0x44d   :  { %6866 = vmatprep.subr.bf16.mxu0 %v7325_v10 }
 0x44e   :  { %6845 = vmatpush3.bf16.msra.mxu1 %v7324_v16 }
 0x450   :  { %6867 = vmatpush3.bf16.msra.mxu0 %v7326_v22 }
 0x451   :  { %5864 = vmatmul.mubr.bf16.vlgmr.msra.gmra.mrb[48].mxu1 %v2580_v19 }
 0x453   :  { %5904 = vmatmul.mubr.bf16.vlgmr.msra.gmra.mrb[52].mxu0 %v2596_v24 }
 0x464   :  { %v6582_v27 = vpop.f32.mrb[24].mxu1 }
 0x465   :  { %v6583_v28 = vpop.f32.mrb[25].mxu1 }
 0x466   :  { %v6584_v29 = vadd.f32 %v6583_v28, %v6582_v27  ;;  %v6585_v30 = vpop.f32.mrb[26].mxu1  ;;  %v6604_v32 = vpop.f32.mrb[28].mxu0 }
 0x467   :  { %v6586_v33 = vpop.f32.mrb[27].mxu1  ;;  %v6605_v34 = vpop.f32.mrb[29].mxu0 }
 0x468   :  { %v5386_v35 = vadd.f32 %v6584_v29, %v5346_v15  ;;  %v6606_v36 = vadd.f32 %v6605_v34, %v6604_v32  ;;  %v6607_v38 = vpop.f32.mrb[30].mxu0 }
 0x469   :  { %v6608_v20 = vpop.f32.mrb[31].mxu0 }
 0x46a   :  { %v5426_v40 = vadd.f32 %v6606_v36, %v5386_v35 }
 0x484   :  { %v6626_v8 = vpop.f32.mrb[28].mxu1 }
 0x485   :  { %v6627_v9 = vpop.f32.mrb[29].mxu1 }
 0x486   :  { %v6628_v1 = vadd.f32 %v6627_v9, %v6626_v8  ;;  %v6629_v21 = vpop.f32.mrb[30].mxu1  ;;  %v6648_v14 = vpop.f32.mrb[32].mxu0 }
 0x487   :  { %v6630_v41 = vpop.f32.mrb[31].mxu1  ;;  %v6649_v42 = vpop.f32.mrb[33].mxu0 }
 0x488   :  { %v5466_v23 = vadd.f32 %v6628_v1, %v5426_v40  ;;  %v6650_v39 = vadd.f32 %v6649_v42, %v6648_v14  ;;  %v6651_v43 = vpop.f32.mrb[34].mxu0 }
 0x489   :  { %v6652_v44 = vpop.f32.mrb[35].mxu0 }
 0x48a   :  { %v5506_v31 = vadd.f32 %v6650_v39, %v5466_v23 }
 0x4a4   :  { %v6670_v45 = vpop.f32.mrb[32].mxu1 }
 0x4a5   :  { %v6671_v11 = vpop.f32.mrb[33].mxu1 }
 0x4a6   :  { %v6672_v46 = vadd.f32 %v6671_v11, %v6670_v45  ;;  %v6673_v13 = vpop.f32.mrb[34].mxu1  ;;  %v6692_v47 = vpop.f32.mrb[36].mxu0 }
 0x4a7   :  { %v6674_v17 = vpop.f32.mrb[35].mxu1  ;;  %v6693_v48 = vpop.f32.mrb[37].mxu0 }
 0x4a8   :  { %v5546_v18 = vadd.f32 %v6672_v46, %v5506_v31  ;;  %v6694_v37 = vadd.f32 %v6693_v48, %v6692_v47  ;;  %v6695_v49 = vpop.f32.mrb[38].mxu0 }
 0x4a9   :  { %v6696_v25 = vpop.f32.mrb[39].mxu0 }
 0x4aa   :  { %v5586_v50 = vadd.f32 %v6694_v37, %v5546_v18 }
 0x4c4   :  { %v6714_v51 = vpop.f32.mrb[36].mxu1 }
 0x4c5   :  { %v6715_v52 = vpop.f32.mrb[37].mxu1 }
 0x4c6   :  { %v6716_v53 = vadd.f32 %v6715_v52, %v6714_v51  ;;  %v6717_v54 = vpop.f32.mrb[38].mxu1  ;;  %v6736_v55 = vpop.f32.mrb[40].mxu0 }
 0x4c7   :  { %v6718_v12 = vpop.f32.mrb[39].mxu1  ;;  %v6737_v56 = vpop.f32.mrb[41].mxu0 }
 0x4c8   :  { %v5626_v57 = vadd.f32 %v6716_v53, %v5586_v50  ;;  %v6738_v26 = vadd.f32 %v6737_v56, %v6736_v55  ;;  %v6739_v58 = vpop.f32.mrb[42].mxu0 }
 0x4c9   :  { %v6740_v59 = vpop.f32.mrb[43].mxu0 }
 0x4ca   :  { %v5666_v60 = vadd.f32 %v6738_v26, %v5626_v57 }
 0x4e4   :  { %v6758_v61 = vpop.f32.mrb[40].mxu1 }
 0x4e5   :  { %v6759_v62 = vpop.f32.mrb[41].mxu1 }
 0x4e6   :  { %v6760_v63 = vadd.f32 %v6759_v62, %v6758_v61  ;;  %v6761_v0 = vpop.f32.mrb[42].mxu1  ;;  %v6780_v2 = vpop.f32.mrb[44].mxu0 }
 0x4e7   :  { %v6762_v3 = vpop.f32.mrb[43].mxu1  ;;  %v6781_v5 = vpop.f32.mrb[45].mxu0 }
 0x4e8   :  { %v5706_v6 = vadd.f32 %v6760_v63, %v5666_v60  ;;  %v6782_v4 = vadd.f32 %v6781_v5, %v6780_v2  ;;  %v6783_v7 = vpop.f32.mrb[46].mxu0 }
 0x4e9   :  { %v6784_v10 = vpop.f32.mrb[47].mxu0 }
 0x4ea   :  { %v5746_v15 = vadd.f32 %v6782_v4, %v5706_v6 }
 0x504   :  { %v6802_v16 = vpop.f32.mrb[44].mxu1 }
 0x505   :  { %v6803_v22 = vpop.f32.mrb[45].mxu1 }
 0x506   :  { %v6804_v19 = vadd.f32 %v6803_v22, %v6802_v16  ;;  %v6805_v24 = vpop.f32.mrb[46].mxu1  ;;  %v6824_v27 = vpop.f32.mrb[48].mxu0 }
 0x507   :  { %v6806_v28 = vpop.f32.mrb[47].mxu1  ;;  %v6825_v29 = vpop.f32.mrb[49].mxu0 }
 0x508   :  { %v5786_v30 = vadd.f32 %v6804_v19, %v5746_v15  ;;  %v6826_v32 = vadd.f32 %v6825_v29, %v6824_v27  ;;  %v6827_v33 = vpop.f32.mrb[50].mxu0 }
 0x509   :  { %v6828_v34 = vpop.f32.mrb[51].mxu0 }
 0x50a   :  { %v5826_v35 = vadd.f32 %v6826_v32, %v5786_v30 }
 0x524   :  { %v6846_v36 = vpop.f32.mrb[48].mxu1 }
 0x525   :  { %v6847_v38 = vpop.f32.mrb[49].mxu1 }
 0x526   :  { %v6848_v20 = vadd.f32 %v6847_v38, %v6846_v36  ;;  %v6849_v40 = vpop.f32.mrb[50].mxu1  ;;  %v6868_v8 = vpop.f32.mrb[52].mxu0 }
 0x527   :  { %v6850_v9 = vpop.f32.mrb[51].mxu1  ;;  %v6869_v1 = vpop.f32.mrb[53].mxu0 }
 0x528   :  { %v5866_v21 = vadd.f32 %v6848_v20, %v5826_v35  ;;  %v6870_v14 = vadd.f32 %v6869_v1, %v6868_v8  ;;  %v6871_v41 = vpop.f32.mrb[54].mxu0 }
 0x529   :  { %v6872_v42 = vpop.f32.mrb[55].mxu0 }
 0x52a   :  { %v5906_v23 = vadd.f32 %v6870_v14, %v5866_v21 }
 0x52c   :  { %v5911_v39 = vmax.f32 %v5906_v23, 0.0 }
 0x52e   :  { %5912 = vst [vmem:[#allocation4] sm:$0x3] %v5911_v39 }
 0x52f   :  { %7342 = shalt.err (!%p7339_p4)
}
 0x530   :  { %s7343_s3 = scalar_lea.hbm %s8985_s6, 32 }
 0x531   :  { %p7344_p5 = scmp.ne.s32.totalorder %s8985_s6, %s7343_s3  ;;  %p7347_p6 = scmp.lt.u32.totalorder %s7343_s3, %s8985_s6 }
 0x533   :  { %p7349_p7 = pnand %p7347_p6, %p7344_p5 }
 0x535   :  { %7352 = shalt.err (!%p7349_p7)
}
 0x536   :  { %5922 = dma.vmem_to_hbm [thread:$0]  %s5920_s20, 32, %s8985_s6, [#allocation5]  }
 0x537   :  { %7353 = dma.done.wait [#allocation5], 32  }
 0x538   :  { %7354 = vsyncadd [#allocation5], 4294967264 }
 0x539   :  { %5926 = vsyncpa [#allocation5], 1 }

</bundles_post_ra>
